<compile_context>
chip_gen: v7x
topology: tpu7x:2x2x1
jax: 0.10.0
libtpu: 0.0.40
codegen_flags: <defaults>
</compile_context>

<pallas_src>
import jax
import jax.numpy as jnp
from jax import lax
from jax.experimental import pallas as pl
from jax.experimental.pallas import tpu as pltpu

B0_VALUE = 1.6   # adaptive-threshold baseline
BETA = 1.8       # adaptation strength
DT = 1.0
R_M = 1.0


def _round_up(x, m):
    return (x + m - 1) // m * m


def _pick_t_blk(T, b_pad, in_dim, h_pad, budget_bytes=12 * 1024 * 1024, max_blk=32):
    """Largest divisor of T (<= max_blk) whose streamed + scratch bytes fit budget."""
    best = 1
    for cand in range(1, min(T, max_blk) + 1):
        if T % cand:
            continue
        streamed = 2 * cand * b_pad * (in_dim + 2 * h_pad) * 4   # dbl-buffered x + 2 outs
        scratch = cand * b_pad * h_pad * 4                       # d_s
        if streamed + scratch <= budget_bytes:
            best = cand
    return best


# ---------------------------------------------------------------------------
# Fused kernel: projection GEMM for a block of T_BLK timesteps + ALIF scan.
#   grid = (T // T_BLK,)  ("arbitrary": sequential recurrence over time)
# ---------------------------------------------------------------------------
def alif_fused_kernel(x_ref, w_ref, bias_ref, alpha_ref, ro_ref, omr_ref,
                      mem0_ref, spike0_ref, b0_ref,
                      mem_out_ref, spike_out_ref, b_fin_ref,
                      d_s, mem_s, spike_s, b_s):
    tb = pl.program_id(0)
    b_pad, h_pad = mem_s.shape
    t_blk = x_ref.shape[0] // b_pad

    # ---- one MXU GEMM per time block.  W columns and bias are pre-scaled
    #      by (1 - alpha), so d_s already holds (1-alpha)*(x @ W + bias). ----
    d_s[...] = (
        jnp.dot(x_ref[...], w_ref[...], preferred_element_type=jnp.float32)
        + bias_ref[...]
    )

    # ---- carried state lives in VMEM scratch across grid steps ----
    @pl.when(tb == 0)
    def _init():
        mem_s[...] = mem0_ref[...]
        spike_s[...] = spike0_ref[...]
        b_s[...] = b0_ref[...]

    # decay vectors broadcast once per block (hoisted out of the time loop)
    alpha = jnp.broadcast_to(alpha_ref[...], (b_pad, h_pad))
    ro = jnp.broadcast_to(ro_ref[...], (b_pad, h_pad))
    omr = jnp.broadcast_to(omr_ref[...], (b_pad, h_pad))

    def step(t, carry):
        mem, spike, b = carry                      # register-carried state
        row = pl.multiple_of(t * b_pad, 8)
        d_t = d_s[pl.ds(row, b_pad), :]

        b = ro * b + omr * spike                   # adaptive threshold state
        big_b = B0_VALUE + BETA * b
        mem = mem * alpha + d_t - big_b * spike    # membrane update (R_m=1, dt=1)
        spike = (mem > big_b).astype(jnp.float32)

        mem_out_ref[pl.ds(row, b_pad), :] = mem
        spike_out_ref[pl.ds(row, b_pad), :] = spike
        return (mem, spike, b)

    mem, spike, b = lax.fori_loop(
        0, t_blk, step, (mem_s[...], spike_s[...], b_s[...]), unroll=True)

    # write the carry back only at the block boundary
    mem_s[...] = mem
    spike_s[...] = spike
    b_s[...] = b

    @pl.when(tb == pl.num_programs(0) - 1)
    def _finalize():
        b_fin_ref[...] = b


# ---------------------------------------------------------------------------
# Wrapper: run the whole sequence (T timesteps).  Returns
#   mem_all [T, B, H], spike_all [T, B, H], b_final [B, H]
# ---------------------------------------------------------------------------
def spike_dense_alif_sequence(x_seq, w, bias, tau_m, tau_adp,
                              mem0, spike0, b_init):
    T, batch, in_dim = x_seq.shape
    out_dim = w.shape[1]

    b_pad = _round_up(batch, 8)      # sublane alignment
    h_pad = _round_up(out_dim, 128)  # lane-dense outputs

    # decay constants computed once (no per-step exp on the EUP)
    alpha = jnp.exp(-DT / tau_m).astype(jnp.float32)   # [1, H]
    ro = jnp.exp(-DT / tau_adp).astype(jnp.float32)    # [1, H]
    oma = 1.0 - alpha
    omr = 1.0 - ro

    def pad_h(a):    # [1, H] -> [1, H_pad]
        return jnp.pad(a.astype(jnp.float32), ((0, 0), (0, h_pad - out_dim)))

    def pad_bh(a):   # [B, H] -> [B_pad, H_pad]
        return jnp.pad(a.astype(jnp.float32),
                       ((0, b_pad - batch), (0, h_pad - out_dim)))

    # fold (1-alpha) gain + bias into the projection: d' = x @ W' + bias'
    w_scaled = jnp.pad((w.astype(jnp.float32) * oma), ((0, 0), (0, h_pad - out_dim)))
    bias_scaled = pad_h(bias * oma)

    alpha_p, ro_p, omr_p = pad_h(alpha), pad_h(ro), pad_h(omr)
    mem0_p, spike0_p, b0_p = pad_bh(mem0), pad_bh(spike0), pad_bh(b_init)

    x_p = jnp.pad(x_seq.astype(jnp.float32),
                  ((0, 0), (0, b_pad - batch), (0, 0)))
    x2d = x_p.reshape(T * b_pad, in_dim)

    t_blk = _pick_t_blk(T, b_pad, in_dim, h_pad)
    n_blocks = T // t_blk
    rows_blk = t_blk * b_pad

    def row_spec():
        return pl.BlockSpec((rows_blk, h_pad), lambda tb: (tb, 0))

    def const2d(shape):
        return pl.BlockSpec(shape, lambda tb: (0, 0))

    mem2d, spike2d, b_final = pl.pallas_call(
        alif_fused_kernel,
        out_shape=(
            jax.ShapeDtypeStruct((T * b_pad, h_pad), jnp.float32),
            jax.ShapeDtypeStruct((T * b_pad, h_pad), jnp.float32),
            jax.ShapeDtypeStruct((b_pad, h_pad), jnp.float32),
        ),
        grid_spec=pltpu.PrefetchScalarGridSpec(
            num_scalar_prefetch=0,
            grid=(n_blocks,),
            in_specs=[
                pl.BlockSpec((rows_blk, in_dim), lambda tb: (tb, 0)),  # x, streamed
                const2d((in_dim, h_pad)),                              # W'  (resident)
                const2d((1, h_pad)),                                   # bias'
                const2d((1, h_pad)),                                   # alpha
                const2d((1, h_pad)),                                   # ro
                const2d((1, h_pad)),                                   # 1 - ro
                const2d((b_pad, h_pad)),                               # mem0
                const2d((b_pad, h_pad)),                               # spike0
                const2d((b_pad, h_pad)),                               # b0
            ],
            out_specs=[row_spec(), row_spec(), const2d((b_pad, h_pad))],
            scratch_shapes=[
                pltpu.VMEM((rows_blk, h_pad), jnp.float32),  # d_s (block projection)
                pltpu.VMEM((b_pad, h_pad), jnp.float32),     # mem carry
                pltpu.VMEM((b_pad, h_pad), jnp.float32),     # spike carry
                pltpu.VMEM((b_pad, h_pad), jnp.float32),     # b carry
            ],
        ),
        compiler_params=pltpu.CompilerParams(
            dimension_semantics=("arbitrary",)),
    )(x2d, w_scaled, bias_scaled, alpha_p, ro_p, omr_p, mem0_p, spike0_p, b0_p)

    mem_all = mem2d.reshape(T, b_pad, h_pad)[:, :batch, :out_dim]
    spike_all = spike2d.reshape(T, b_pad, h_pad)[:, :batch, :out_dim]
    return mem_all, spike_all, b_final[:batch, :out_dim]


def spike_dense_alif_forward(x, w, bias, tau_m, tau_adp, mem, spike, b):
    """Single timestep (mirrors the module's forward). Returns (mem, spike, b)."""
    mem_all, spike_all, b_final = spike_dense_alif_sequence(
        x[None], w, bias, tau_m, tau_adp, mem, spike, b)
    return mem_all[0], spike_all[0], b_final


if __name__ == "__main__":
    key = jax.random.PRNGKey(0)
    T = 16
    batch = 8
    input_dim = 64
    output_dim = 32

    k_w, k_b, k_tm, k_ta, k_x = jax.random.split(key, 5)

    # nn.Linear init; PyTorch stores weight as [out, in] -> transpose for x @ W.
    bound = 1.0 / jnp.sqrt(input_dim)
    w_pt = jax.random.uniform(k_w, (output_dim, input_dim),
                              minval=-bound, maxval=bound, dtype=jnp.float32)
    w = w_pt.T                                                   # [in, out]
    bias = jax.random.uniform(k_b, (1, output_dim),
                              minval=-bound, maxval=bound, dtype=jnp.float32)

    # tau initializer 'normal': N(20, 5) and N(200, 5)
    tau_m = 20.0 + 5.0 * jax.random.normal(k_tm, (1, output_dim), dtype=jnp.float32)
    tau_adp = 200.0 + 5.0 * jax.random.normal(k_ta, (1, output_dim), dtype=jnp.float32)

    # set_neuron_state(batch)
    mem0 = jnp.zeros((batch, output_dim), jnp.float32)
    spike0 = jnp.zeros((batch, output_dim), jnp.float32)
    b_init = jnp.ones((batch, output_dim), jnp.float32) * B0_VALUE

    # binary input spike train over T timesteps
    x_seq = (jax.random.uniform(k_x, (T, batch, input_dim)) > 0.5).astype(jnp.float32)

    mem_all, spike_all, b_final = spike_dense_alif_sequence(
        x_seq, w, bias, tau_m, tau_adp, mem0, spike0, b_init)
    jax.block_until_ready((mem_all, spike_all, b_final))

    # pure-JAX reference: step the module forward T times
    alpha = jnp.exp(-DT / tau_m)
    ro = jnp.exp(-DT / tau_adp)
    mem_r, spike_r, b_r = mem0, spike0, b_init
    mems, spikes = [], []
    for t in range(T):
        d = x_seq[t] @ w + bias
        b_r = ro * b_r + (1.0 - ro) * spike_r
        big_b = B0_VALUE + BETA * b_r
        mem_r = mem_r * alpha + (1.0 - alpha) * R_M * d - big_b * spike_r * DT
        spike_r = (mem_r - big_b > 0.0).astype(jnp.float32)
        mems.append(mem_r)
        spikes.append(spike_r)
    mem_ref = jnp.stack(mems)
    spike_ref = jnp.stack(spikes)

    assert jnp.allclose(mem_all, mem_ref, atol=1e-4, rtol=1e-4)
    assert jnp.allclose(spike_all, spike_ref)
    assert jnp.allclose(b_final, b_r, atol=1e-5, rtol=1e-5)

    # single-step wrapper (module forward) sanity check against step 0
    m1, s1, b1 = spike_dense_alif_forward(
        x_seq[0], w, bias, tau_m, tau_adp, mem0, spike0, b_init)
    jax.block_until_ready((m1, s1, b1))
    assert jnp.allclose(m1, mem_ref[0], atol=1e-4, rtol=1e-4)
    assert jnp.allclose(s1, spike_ref[0])

    print("KERNEL_OK")
</pallas_src>

<mosaic_0001>
module attributes {stable_mosaic.version = 11 : i64} {
  func.func @alif_fused_kernel(%arg0: i32, %arg1: memref<128x64xf32, #tpu.memory_space<vmem>>, %arg2: memref<64x128xf32, #tpu.memory_space<vmem>>, %arg3: memref<1x128xf32, #tpu.memory_space<vmem>>, %arg4: memref<1x128xf32, #tpu.memory_space<vmem>>, %arg5: memref<1x128xf32, #tpu.memory_space<vmem>>, %arg6: memref<1x128xf32, #tpu.memory_space<vmem>>, %arg7: memref<8x128xf32, #tpu.memory_space<vmem>>, %arg8: memref<8x128xf32, #tpu.memory_space<vmem>>, %arg9: memref<8x128xf32, #tpu.memory_space<vmem>>, %arg10: memref<128x128xf32, #tpu.memory_space<vmem>>, %arg11: memref<128x128xf32, #tpu.memory_space<vmem>>, %arg12: memref<8x128xf32, #tpu.memory_space<vmem>>, %arg13: memref<128x128xf32, #tpu.memory_space<vmem>>, %arg14: memref<8x128xf32, #tpu.memory_space<vmem>>, %arg15: memref<8x128xf32, #tpu.memory_space<vmem>>, %arg16: memref<8x128xf32, #tpu.memory_space<vmem>>) attributes {dimension_semantics = [#tpu.dimension_semantics<arbitrary>], iteration_bounds = array<i64: 1>, scalar_prefetch = 0 : i64, scratch_operands = 4 : i64, tpu.core_type = #tpu.core_type<tc>, window_params = [{transform_indices = @transform_0, window_bounds = array<i64: 128, 64>}, {pipeline_mode = #tpu.pipeline_mode<synchronous>, transform_indices = @transform_1, window_bounds = array<i64: 64, 128>}, {pipeline_mode = #tpu.pipeline_mode<synchronous>, transform_indices = @transform_2, window_bounds = array<i64: 1, 128>}, {pipeline_mode = #tpu.pipeline_mode<synchronous>, transform_indices = @transform_3, window_bounds = array<i64: 1, 128>}, {pipeline_mode = #tpu.pipeline_mode<synchronous>, transform_indices = @transform_4, window_bounds = array<i64: 1, 128>}, {pipeline_mode = #tpu.pipeline_mode<synchronous>, transform_indices = @transform_5, window_bounds = array<i64: 1, 128>}, {pipeline_mode = #tpu.pipeline_mode<synchronous>, transform_indices = @transform_6, window_bounds = array<i64: 8, 128>}, {pipeline_mode = #tpu.pipeline_mode<synchronous>, transform_indices = @transform_7, window_bounds = array<i64: 8, 128>}, {pipeline_mode = #tpu.pipeline_mode<synchronous>, transform_indices = @transform_8, window_bounds = array<i64: 8, 128>}, {transform_indices = @transform_9, window_bounds = array<i64: 128, 128>}, {transform_indices = @transform_10, window_bounds = array<i64: 128, 128>}, {pipeline_mode = #tpu.pipeline_mode<synchronous>, transform_indices = @transform_11, window_bounds = array<i64: 8, 128>}]} {
    %c0 = arith.constant 0 : index
    %c0_0 = arith.constant 0 : index
    %0 = vector.load %arg1[%c0, %c0_0] : memref<128x64xf32, #tpu.memory_space<vmem>>, vector<128x64xf32>
    %c0_1 = arith.constant 0 : index
    %c0_2 = arith.constant 0 : index
    %1 = vector.load %arg2[%c0_1, %c0_2] : memref<64x128xf32, #tpu.memory_space<vmem>>, vector<64x128xf32>
    %cst = arith.constant dense<0.000000e+00> : vector<128x128xf32>
    %2 = tpu.matmul %0, %1, %cst {dimension_numbers = #tpu.dot_dimension_numbers<[1], [0], [0], [1], [0, 0, 1, 1], [], []>} : vector<128x64xf32>, vector<64x128xf32>, vector<128x128xf32> -> vector<128x128xf32>
    %c0_3 = arith.constant 0 : index
    %c0_4 = arith.constant 0 : index
    %3 = vector.load %arg3[%c0_3, %c0_4] : memref<1x128xf32, #tpu.memory_space<vmem>>, vector<1x128xf32>
    %4 = vector.broadcast %3 : vector<1x128xf32> to vector<128x128xf32>
    %5 = arith.addf %2, %4 : vector<128x128xf32>
    %c0_5 = arith.constant 0 : index
    %c0_6 = arith.constant 0 : index
    %6 = vector.load %arg13[%c0_5, %c0_6] : memref<128x128xf32, #tpu.memory_space<vmem>>, vector<128x128xf32>
    tpu.vector_store %arg13[%c0_5, %c0_6], %5 {strides = array<i32>} : memref<128x128xf32, #tpu.memory_space<vmem>>, vector<128x128xf32>,
    %c0_i32 = arith.constant 0 : i32
    %7 = arith.cmpi eq, %arg0, %c0_i32 : i32
    %8 = arith.extui %7 : i1 to i32
    %c0_i32_7 = arith.constant 0 : i32
    %9 = arith.cmpi ne, %8, %c0_i32_7 : i32
    scf.if %9 {
      %c0_125 = arith.constant 0 : index
      %c0_126 = arith.constant 0 : index
      %380 = vector.load %arg7[%c0_125, %c0_126] : memref<8x128xf32, #tpu.memory_space<vmem>>, vector<8x128xf32>
      %c0_127 = arith.constant 0 : index
      %c0_128 = arith.constant 0 : index
      %381 = vector.load %arg14[%c0_127, %c0_128] : memref<8x128xf32, #tpu.memory_space<vmem>>, vector<8x128xf32>
      tpu.vector_store %arg14[%c0_127, %c0_128], %380 {strides = array<i32>} : memref<8x128xf32, #tpu.memory_space<vmem>>, vector<8x128xf32>,
      %c0_129 = arith.constant 0 : index
      %c0_130 = arith.constant 0 : index
      %382 = vector.load %arg8[%c0_129, %c0_130] : memref<8x128xf32, #tpu.memory_space<vmem>>, vector<8x128xf32>
      %c0_131 = arith.constant 0 : index
      %c0_132 = arith.constant 0 : index
      %383 = vector.load %arg15[%c0_131, %c0_132] : memref<8x128xf32, #tpu.memory_space<vmem>>, vector<8x128xf32>
      tpu.vector_store %arg15[%c0_131, %c0_132], %382 {strides = array<i32>} : memref<8x128xf32, #tpu.memory_space<vmem>>, vector<8x128xf32>,
      %c0_133 = arith.constant 0 : index
      %c0_134 = arith.constant 0 : index
      %384 = vector.load %arg9[%c0_133, %c0_134] : memref<8x128xf32, #tpu.memory_space<vmem>>, vector<8x128xf32>
      %c0_135 = arith.constant 0 : index
      %c0_136 = arith.constant 0 : index
      %385 = vector.load %arg16[%c0_135, %c0_136] : memref<8x128xf32, #tpu.memory_space<vmem>>, vector<8x128xf32>
      tpu.vector_store %arg16[%c0_135, %c0_136], %384 {strides = array<i32>} : memref<8x128xf32, #tpu.memory_space<vmem>>, vector<8x128xf32>,
    } else {
    }
    %c0_8 = arith.constant 0 : index
    %c0_9 = arith.constant 0 : index
    %10 = vector.load %arg4[%c0_8, %c0_9] : memref<1x128xf32, #tpu.memory_space<vmem>>, vector<1x128xf32>
    %11 = vector.shape_cast %10 : vector<1x128xf32> to vector<1x128xf32>
    %12 = vector.broadcast %11 : vector<1x128xf32> to vector<8x128xf32>
    %c0_10 = arith.constant 0 : index
    %c0_11 = arith.constant 0 : index
    %13 = vector.load %arg5[%c0_10, %c0_11] : memref<1x128xf32, #tpu.memory_space<vmem>>, vector<1x128xf32>
    %14 = vector.shape_cast %13 : vector<1x128xf32> to vector<1x128xf32>
    %15 = vector.broadcast %14 : vector<1x128xf32> to vector<8x128xf32>
    %c0_12 = arith.constant 0 : index
    %c0_13 = arith.constant 0 : index
    %16 = vector.load %arg6[%c0_12, %c0_13] : memref<1x128xf32, #tpu.memory_space<vmem>>, vector<1x128xf32>
    %17 = vector.shape_cast %16 : vector<1x128xf32> to vector<1x128xf32>
    %18 = vector.broadcast %17 : vector<1x128xf32> to vector<8x128xf32>
    %c0_14 = arith.constant 0 : index
    %c0_15 = arith.constant 0 : index
    %19 = vector.load %arg14[%c0_14, %c0_15] : memref<8x128xf32, #tpu.memory_space<vmem>>, vector<8x128xf32>
    %c0_16 = arith.constant 0 : index
    %c0_17 = arith.constant 0 : index
    %20 = vector.load %arg15[%c0_16, %c0_17] : memref<8x128xf32, #tpu.memory_space<vmem>>, vector<8x128xf32>
    %c0_18 = arith.constant 0 : index
    %c0_19 = arith.constant 0 : index
    %21 = vector.load %arg16[%c0_18, %c0_19] : memref<8x128xf32, #tpu.memory_space<vmem>>, vector<8x128xf32>
    %c0_i32_20 = arith.constant 0 : i32
    %c8_i32 = arith.constant 8 : i32
    %22 = arith.muli %c0_i32_20, %c8_i32 : i32
    %23 = tpu.assume_multiple %22, 8 : i32
    %24 = arith.index_cast %23 : i32 to index
    %c0_21 = arith.constant 0 : index
    %25 = vector.load %arg13[%24, %c0_21] : memref<128x128xf32, #tpu.memory_space<vmem>>, vector<8x128xf32>
    %26 = arith.mulf %15, %21 : vector<8x128xf32>
    %27 = arith.mulf %18, %20 : vector<8x128xf32>
    %28 = arith.addf %26, %27 : vector<8x128xf32>
    %cst_22 = arith.constant 1.800000e+00 : f32
    %29 = vector.broadcast %cst_22 : f32 to vector<8x128xf32>
    %30 = arith.mulf %29, %28 : vector<8x128xf32>
    %cst_23 = arith.constant 1.600000e+00 : f32
    %31 = vector.broadcast %cst_23 : f32 to vector<8x128xf32>
    %32 = arith.addf %31, %30 : vector<8x128xf32>
    %33 = arith.mulf %19, %12 : vector<8x128xf32>
    %34 = arith.addf %33, %25 : vector<8x128xf32>
    %35 = arith.mulf %32, %20 : vector<8x128xf32>
    %36 = arith.subf %34, %35 : vector<8x128xf32>
    %37 = arith.cmpf ogt, %36, %32 : vector<8x128xf32>
    %38 = arith.extui %37 : vector<8x128xi1> to vector<8x128xi32>
    %39 = arith.sitofp %38 : vector<8x128xi32> to vector<8x128xf32>
    %40 = arith.index_cast %23 : i32 to index
    %c0_24 = arith.constant 0 : index
    %41 = vector.load %arg10[%40, %c0_24] : memref<128x128xf32, #tpu.memory_space<vmem>>, vector<8x128xf32>
    tpu.vector_store %arg10[%40, %c0_24], %36 {strides = array<i32>} : memref<128x128xf32, #tpu.memory_space<vmem>>, vector<8x128xf32>,
    %42 = arith.index_cast %23 : i32 to index
    %c0_25 = arith.constant 0 : index
    %43 = vector.load %arg11[%42, %c0_25] : memref<128x128xf32, #tpu.memory_space<vmem>>, vector<8x128xf32>
    tpu.vector_store %arg11[%42, %c0_25], %39 {strides = array<i32>} : memref<128x128xf32, #tpu.memory_space<vmem>>, vector<8x128xf32>,
    %c1_i32 = arith.constant 1 : i32
    %c8_i32_26 = arith.constant 8 : i32
    %44 = arith.muli %c1_i32, %c8_i32_26 : i32
    %45 = tpu.assume_multiple %44, 8 : i32
    %46 = arith.index_cast %45 : i32 to index
    %c0_27 = arith.constant 0 : index
    %47 = vector.load %arg13[%46, %c0_27] : memref<128x128xf32, #tpu.memory_space<vmem>>, vector<8x128xf32>
    %48 = arith.mulf %15, %28 : vector<8x128xf32>
    %49 = arith.mulf %18, %39 : vector<8x128xf32>
    %50 = arith.addf %48, %49 : vector<8x128xf32>
    %cst_28 = arith.constant 1.800000e+00 : f32
    %51 = vector.broadcast %cst_28 : f32 to vector<8x128xf32>
    %52 = arith.mulf %51, %50 : vector<8x128xf32>
    %cst_29 = arith.constant 1.600000e+00 : f32
    %53 = vector.broadcast %cst_29 : f32 to vector<8x128xf32>
    %54 = arith.addf %53, %52 : vector<8x128xf32>
    %55 = arith.mulf %36, %12 : vector<8x128xf32>
    %56 = arith.addf %55, %47 : vector<8x128xf32>
    %57 = arith.mulf %54, %39 : vector<8x128xf32>
    %58 = arith.subf %56, %57 : vector<8x128xf32>
    %59 = arith.cmpf ogt, %58, %54 : vector<8x128xf32>
    %60 = arith.extui %59 : vector<8x128xi1> to vector<8x128xi32>
    %61 = arith.sitofp %60 : vector<8x128xi32> to vector<8x128xf32>
    %62 = arith.index_cast %45 : i32 to index
    %c0_30 = arith.constant 0 : index
    %63 = vector.load %arg10[%62, %c0_30] : memref<128x128xf32, #tpu.memory_space<vmem>>, vector<8x128xf32>
    tpu.vector_store %arg10[%62, %c0_30], %58 {strides = array<i32>} : memref<128x128xf32, #tpu.memory_space<vmem>>, vector<8x128xf32>,
    %64 = arith.index_cast %45 : i32 to index
    %c0_31 = arith.constant 0 : index
    %65 = vector.load %arg11[%64, %c0_31] : memref<128x128xf32, #tpu.memory_space<vmem>>, vector<8x128xf32>
    tpu.vector_store %arg11[%64, %c0_31], %61 {strides = array<i32>} : memref<128x128xf32, #tpu.memory_space<vmem>>, vector<8x128xf32>,
    %c2_i32 = arith.constant 2 : i32
    %c8_i32_32 = arith.constant 8 : i32
    %66 = arith.muli %c2_i32, %c8_i32_32 : i32
    %67 = tpu.assume_multiple %66, 8 : i32
    %68 = arith.index_cast %67 : i32 to index
    %c0_33 = arith.constant 0 : index
    %69 = vector.load %arg13[%68, %c0_33] : memref<128x128xf32, #tpu.memory_space<vmem>>, vector<8x128xf32>
    %70 = arith.mulf %15, %50 : vector<8x128xf32>
    %71 = arith.mulf %18, %61 : vector<8x128xf32>
    %72 = arith.addf %70, %71 : vector<8x128xf32>
    %cst_34 = arith.constant 1.800000e+00 : f32
    %73 = vector.broadcast %cst_34 : f32 to vector<8x128xf32>
    %74 = arith.mulf %73, %72 : vector<8x128xf32>
    %cst_35 = arith.constant 1.600000e+00 : f32
    %75 = vector.broadcast %cst_35 : f32 to vector<8x128xf32>
    %76 = arith.addf %75, %74 : vector<8x128xf32>
    %77 = arith.mulf %58, %12 : vector<8x128xf32>
    %78 = arith.addf %77, %69 : vector<8x128xf32>
    %79 = arith.mulf %76, %61 : vector<8x128xf32>
    %80 = arith.subf %78, %79 : vector<8x128xf32>
    %81 = arith.cmpf ogt, %80, %76 : vector<8x128xf32>
    %82 = arith.extui %81 : vector<8x128xi1> to vector<8x128xi32>
    %83 = arith.sitofp %82 : vector<8x128xi32> to vector<8x128xf32>
    %84 = arith.index_cast %67 : i32 to index
    %c0_36 = arith.constant 0 : index
    %85 = vector.load %arg10[%84, %c0_36] : memref<128x128xf32, #tpu.memory_space<vmem>>, vector<8x128xf32>
    tpu.vector_store %arg10[%84, %c0_36], %80 {strides = array<i32>} : memref<128x128xf32, #tpu.memory_space<vmem>>, vector<8x128xf32>,
    %86 = arith.index_cast %67 : i32 to index
    %c0_37 = arith.constant 0 : index
    %87 = vector.load %arg11[%86, %c0_37] : memref<128x128xf32, #tpu.memory_space<vmem>>, vector<8x128xf32>
    tpu.vector_store %arg11[%86, %c0_37], %83 {strides = array<i32>} : memref<128x128xf32, #tpu.memory_space<vmem>>, vector<8x128xf32>,
    %c3_i32 = arith.constant 3 : i32
    %c8_i32_38 = arith.constant 8 : i32
    %88 = arith.muli %c3_i32, %c8_i32_38 : i32
    %89 = tpu.assume_multiple %88, 8 : i32
    %90 = arith.index_cast %89 : i32 to index
    %c0_39 = arith.constant 0 : index
    %91 = vector.load %arg13[%90, %c0_39] : memref<128x128xf32, #tpu.memory_space<vmem>>, vector<8x128xf32>
    %92 = arith.mulf %15, %72 : vector<8x128xf32>
    %93 = arith.mulf %18, %83 : vector<8x128xf32>
    %94 = arith.addf %92, %93 : vector<8x128xf32>
    %cst_40 = arith.constant 1.800000e+00 : f32
    %95 = vector.broadcast %cst_40 : f32 to vector<8x128xf32>
    %96 = arith.mulf %95, %94 : vector<8x128xf32>
    %cst_41 = arith.constant 1.600000e+00 : f32
    %97 = vector.broadcast %cst_41 : f32 to vector<8x128xf32>
    %98 = arith.addf %97, %96 : vector<8x128xf32>
    %99 = arith.mulf %80, %12 : vector<8x128xf32>
    %100 = arith.addf %99, %91 : vector<8x128xf32>
    %101 = arith.mulf %98, %83 : vector<8x128xf32>
    %102 = arith.subf %100, %101 : vector<8x128xf32>
    %103 = arith.cmpf ogt, %102, %98 : vector<8x128xf32>
    %104 = arith.extui %103 : vector<8x128xi1> to vector<8x128xi32>
    %105 = arith.sitofp %104 : vector<8x128xi32> to vector<8x128xf32>
    %106 = arith.index_cast %89 : i32 to index
    %c0_42 = arith.constant 0 : index
    %107 = vector.load %arg10[%106, %c0_42] : memref<128x128xf32, #tpu.memory_space<vmem>>, vector<8x128xf32>
    tpu.vector_store %arg10[%106, %c0_42], %102 {strides = array<i32>} : memref<128x128xf32, #tpu.memory_space<vmem>>, vector<8x128xf32>,
    %108 = arith.index_cast %89 : i32 to index
    %c0_43 = arith.constant 0 : index
    %109 = vector.load %arg11[%108, %c0_43] : memref<128x128xf32, #tpu.memory_space<vmem>>, vector<8x128xf32>
    tpu.vector_store %arg11[%108, %c0_43], %105 {strides = array<i32>} : memref<128x128xf32, #tpu.memory_space<vmem>>, vector<8x128xf32>,
    %c4_i32 = arith.constant 4 : i32
    %c8_i32_44 = arith.constant 8 : i32
    %110 = arith.muli %c4_i32, %c8_i32_44 : i32
    %111 = tpu.assume_multiple %110, 8 : i32
    %112 = arith.index_cast %111 : i32 to index
    %c0_45 = arith.constant 0 : index
    %113 = vector.load %arg13[%112, %c0_45] : memref<128x128xf32, #tpu.memory_space<vmem>>, vector<8x128xf32>
    %114 = arith.mulf %15, %94 : vector<8x128xf32>
    %115 = arith.mulf %18, %105 : vector<8x128xf32>
    %116 = arith.addf %114, %115 : vector<8x128xf32>
    %cst_46 = arith.constant 1.800000e+00 : f32
    %117 = vector.broadcast %cst_46 : f32 to vector<8x128xf32>
    %118 = arith.mulf %117, %116 : vector<8x128xf32>
    %cst_47 = arith.constant 1.600000e+00 : f32
    %119 = vector.broadcast %cst_47 : f32 to vector<8x128xf32>
    %120 = arith.addf %119, %118 : vector<8x128xf32>
    %121 = arith.mulf %102, %12 : vector<8x128xf32>
    %122 = arith.addf %121, %113 : vector<8x128xf32>
    %123 = arith.mulf %120, %105 : vector<8x128xf32>
    %124 = arith.subf %122, %123 : vector<8x128xf32>
    %125 = arith.cmpf ogt, %124, %120 : vector<8x128xf32>
    %126 = arith.extui %125 : vector<8x128xi1> to vector<8x128xi32>
    %127 = arith.sitofp %126 : vector<8x128xi32> to vector<8x128xf32>
    %128 = arith.index_cast %111 : i32 to index
    %c0_48 = arith.constant 0 : index
    %129 = vector.load %arg10[%128, %c0_48] : memref<128x128xf32, #tpu.memory_space<vmem>>, vector<8x128xf32>
    tpu.vector_store %arg10[%128, %c0_48], %124 {strides = array<i32>} : memref<128x128xf32, #tpu.memory_space<vmem>>, vector<8x128xf32>,
    %130 = arith.index_cast %111 : i32 to index
    %c0_49 = arith.constant 0 : index
    %131 = vector.load %arg11[%130, %c0_49] : memref<128x128xf32, #tpu.memory_space<vmem>>, vector<8x128xf32>
    tpu.vector_store %arg11[%130, %c0_49], %127 {strides = array<i32>} : memref<128x128xf32, #tpu.memory_space<vmem>>, vector<8x128xf32>,
    %c5_i32 = arith.constant 5 : i32
    %c8_i32_50 = arith.constant 8 : i32
    %132 = arith.muli %c5_i32, %c8_i32_50 : i32
    %133 = tpu.assume_multiple %132, 8 : i32
    %134 = arith.index_cast %133 : i32 to index
    %c0_51 = arith.constant 0 : index
    %135 = vector.load %arg13[%134, %c0_51] : memref<128x128xf32, #tpu.memory_space<vmem>>, vector<8x128xf32>
    %136 = arith.mulf %15, %116 : vector<8x128xf32>
    %137 = arith.mulf %18, %127 : vector<8x128xf32>
    %138 = arith.addf %136, %137 : vector<8x128xf32>
    %cst_52 = arith.constant 1.800000e+00 : f32
    %139 = vector.broadcast %cst_52 : f32 to vector<8x128xf32>
    %140 = arith.mulf %139, %138 : vector<8x128xf32>
    %cst_53 = arith.constant 1.600000e+00 : f32
    %141 = vector.broadcast %cst_53 : f32 to vector<8x128xf32>
    %142 = arith.addf %141, %140 : vector<8x128xf32>
    %143 = arith.mulf %124, %12 : vector<8x128xf32>
    %144 = arith.addf %143, %135 : vector<8x128xf32>
    %145 = arith.mulf %142, %127 : vector<8x128xf32>
    %146 = arith.subf %144, %145 : vector<8x128xf32>
    %147 = arith.cmpf ogt, %146, %142 : vector<8x128xf32>
    %148 = arith.extui %147 : vector<8x128xi1> to vector<8x128xi32>
    %149 = arith.sitofp %148 : vector<8x128xi32> to vector<8x128xf32>
    %150 = arith.index_cast %133 : i32 to index
    %c0_54 = arith.constant 0 : index
    %151 = vector.load %arg10[%150, %c0_54] : memref<128x128xf32, #tpu.memory_space<vmem>>, vector<8x128xf32>
    tpu.vector_store %arg10[%150, %c0_54], %146 {strides = array<i32>} : memref<128x128xf32, #tpu.memory_space<vmem>>, vector<8x128xf32>,
    %152 = arith.index_cast %133 : i32 to index
    %c0_55 = arith.constant 0 : index
    %153 = vector.load %arg11[%152, %c0_55] : memref<128x128xf32, #tpu.memory_space<vmem>>, vector<8x128xf32>
    tpu.vector_store %arg11[%152, %c0_55], %149 {strides = array<i32>} : memref<128x128xf32, #tpu.memory_space<vmem>>, vector<8x128xf32>,
    %c6_i32 = arith.constant 6 : i32
    %c8_i32_56 = arith.constant 8 : i32
    %154 = arith.muli %c6_i32, %c8_i32_56 : i32
    %155 = tpu.assume_multiple %154, 8 : i32
    %156 = arith.index_cast %155 : i32 to index
    %c0_57 = arith.constant 0 : index
    %157 = vector.load %arg13[%156, %c0_57] : memref<128x128xf32, #tpu.memory_space<vmem>>, vector<8x128xf32>
    %158 = arith.mulf %15, %138 : vector<8x128xf32>
    %159 = arith.mulf %18, %149 : vector<8x128xf32>
    %160 = arith.addf %158, %159 : vector<8x128xf32>
    %cst_58 = arith.constant 1.800000e+00 : f32
    %161 = vector.broadcast %cst_58 : f32 to vector<8x128xf32>
    %162 = arith.mulf %161, %160 : vector<8x128xf32>
    %cst_59 = arith.constant 1.600000e+00 : f32
    %163 = vector.broadcast %cst_59 : f32 to vector<8x128xf32>
    %164 = arith.addf %163, %162 : vector<8x128xf32>
    %165 = arith.mulf %146, %12 : vector<8x128xf32>
    %166 = arith.addf %165, %157 : vector<8x128xf32>
    %167 = arith.mulf %164, %149 : vector<8x128xf32>
    %168 = arith.subf %166, %167 : vector<8x128xf32>
    %169 = arith.cmpf ogt, %168, %164 : vector<8x128xf32>
    %170 = arith.extui %169 : vector<8x128xi1> to vector<8x128xi32>
    %171 = arith.sitofp %170 : vector<8x128xi32> to vector<8x128xf32>
    %172 = arith.index_cast %155 : i32 to index
    %c0_60 = arith.constant 0 : index
    %173 = vector.load %arg10[%172, %c0_60] : memref<128x128xf32, #tpu.memory_space<vmem>>, vector<8x128xf32>
    tpu.vector_store %arg10[%172, %c0_60], %168 {strides = array<i32>} : memref<128x128xf32, #tpu.memory_space<vmem>>, vector<8x128xf32>,
    %174 = arith.index_cast %155 : i32 to index
    %c0_61 = arith.constant 0 : index
    %175 = vector.load %arg11[%174, %c0_61] : memref<128x128xf32, #tpu.memory_space<vmem>>, vector<8x128xf32>
    tpu.vector_store %arg11[%174, %c0_61], %171 {strides = array<i32>} : memref<128x128xf32, #tpu.memory_space<vmem>>, vector<8x128xf32>,
    %c7_i32 = arith.constant 7 : i32
    %c8_i32_62 = arith.constant 8 : i32
    %176 = arith.muli %c7_i32, %c8_i32_62 : i32
    %177 = tpu.assume_multiple %176, 8 : i32
    %178 = arith.index_cast %177 : i32 to index
    %c0_63 = arith.constant 0 : index
    %179 = vector.load %arg13[%178, %c0_63] : memref<128x128xf32, #tpu.memory_space<vmem>>, vector<8x128xf32>
    %180 = arith.mulf %15, %160 : vector<8x128xf32>
    %181 = arith.mulf %18, %171 : vector<8x128xf32>
    %182 = arith.addf %180, %181 : vector<8x128xf32>
    %cst_64 = arith.constant 1.800000e+00 : f32
    %183 = vector.broadcast %cst_64 : f32 to vector<8x128xf32>
    %184 = arith.mulf %183, %182 : vector<8x128xf32>
    %cst_65 = arith.constant 1.600000e+00 : f32
    %185 = vector.broadcast %cst_65 : f32 to vector<8x128xf32>
    %186 = arith.addf %185, %184 : vector<8x128xf32>
    %187 = arith.mulf %168, %12 : vector<8x128xf32>
    %188 = arith.addf %187, %179 : vector<8x128xf32>
    %189 = arith.mulf %186, %171 : vector<8x128xf32>
    %190 = arith.subf %188, %189 : vector<8x128xf32>
    %191 = arith.cmpf ogt, %190, %186 : vector<8x128xf32>
    %192 = arith.extui %191 : vector<8x128xi1> to vector<8x128xi32>
    %193 = arith.sitofp %192 : vector<8x128xi32> to vector<8x128xf32>
    %194 = arith.index_cast %177 : i32 to index
    %c0_66 = arith.constant 0 : index
    %195 = vector.load %arg10[%194, %c0_66] : memref<128x128xf32, #tpu.memory_space<vmem>>, vector<8x128xf32>
    tpu.vector_store %arg10[%194, %c0_66], %190 {strides = array<i32>} : memref<128x128xf32, #tpu.memory_space<vmem>>, vector<8x128xf32>,
    %196 = arith.index_cast %177 : i32 to index
    %c0_67 = arith.constant 0 : index
    %197 = vector.load %arg11[%196, %c0_67] : memref<128x128xf32, #tpu.memory_space<vmem>>, vector<8x128xf32>
    tpu.vector_store %arg11[%196, %c0_67], %193 {strides = array<i32>} : memref<128x128xf32, #tpu.memory_space<vmem>>, vector<8x128xf32>,
    %c8_i32_68 = arith.constant 8 : i32
    %c8_i32_69 = arith.constant 8 : i32
    %198 = arith.muli %c8_i32_68, %c8_i32_69 : i32
    %199 = tpu.assume_multiple %198, 8 : i32
    %200 = arith.index_cast %199 : i32 to index
    %c0_70 = arith.constant 0 : index
    %201 = vector.load %arg13[%200, %c0_70] : memref<128x128xf32, #tpu.memory_space<vmem>>, vector<8x128xf32>
    %202 = arith.mulf %15, %182 : vector<8x128xf32>
    %203 = arith.mulf %18, %193 : vector<8x128xf32>
    %204 = arith.addf %202, %203 : vector<8x128xf32>
    %cst_71 = arith.constant 1.800000e+00 : f32
    %205 = vector.broadcast %cst_71 : f32 to vector<8x128xf32>
    %206 = arith.mulf %205, %204 : vector<8x128xf32>
    %cst_72 = arith.constant 1.600000e+00 : f32
    %207 = vector.broadcast %cst_72 : f32 to vector<8x128xf32>
    %208 = arith.addf %207, %206 : vector<8x128xf32>
    %209 = arith.mulf %190, %12 : vector<8x128xf32>
    %210 = arith.addf %209, %201 : vector<8x128xf32>
    %211 = arith.mulf %208, %193 : vector<8x128xf32>
    %212 = arith.subf %210, %211 : vector<8x128xf32>
    %213 = arith.cmpf ogt, %212, %208 : vector<8x128xf32>
    %214 = arith.extui %213 : vector<8x128xi1> to vector<8x128xi32>
    %215 = arith.sitofp %214 : vector<8x128xi32> to vector<8x128xf32>
    %216 = arith.index_cast %199 : i32 to index
    %c0_73 = arith.constant 0 : index
    %217 = vector.load %arg10[%216, %c0_73] : memref<128x128xf32, #tpu.memory_space<vmem>>, vector<8x128xf32>
    tpu.vector_store %arg10[%216, %c0_73], %212 {strides = array<i32>} : memref<128x128xf32, #tpu.memory_space<vmem>>, vector<8x128xf32>,
    %218 = arith.index_cast %199 : i32 to index
    %c0_74 = arith.constant 0 : index
    %219 = vector.load %arg11[%218, %c0_74] : memref<128x128xf32, #tpu.memory_space<vmem>>, vector<8x128xf32>
    tpu.vector_store %arg11[%218, %c0_74], %215 {strides = array<i32>} : memref<128x128xf32, #tpu.memory_space<vmem>>, vector<8x128xf32>,
    %c9_i32 = arith.constant 9 : i32
    %c8_i32_75 = arith.constant 8 : i32
    %220 = arith.muli %c9_i32, %c8_i32_75 : i32
    %221 = tpu.assume_multiple %220, 8 : i32
    %222 = arith.index_cast %221 : i32 to index
    %c0_76 = arith.constant 0 : index
    %223 = vector.load %arg13[%222, %c0_76] : memref<128x128xf32, #tpu.memory_space<vmem>>, vector<8x128xf32>
    %224 = arith.mulf %15, %204 : vector<8x128xf32>
    %225 = arith.mulf %18, %215 : vector<8x128xf32>
    %226 = arith.addf %224, %225 : vector<8x128xf32>
    %cst_77 = arith.constant 1.800000e+00 : f32
    %227 = vector.broadcast %cst_77 : f32 to vector<8x128xf32>
    %228 = arith.mulf %227, %226 : vector<8x128xf32>
    %cst_78 = arith.constant 1.600000e+00 : f32
    %229 = vector.broadcast %cst_78 : f32 to vector<8x128xf32>
    %230 = arith.addf %229, %228 : vector<8x128xf32>
    %231 = arith.mulf %212, %12 : vector<8x128xf32>
    %232 = arith.addf %231, %223 : vector<8x128xf32>
    %233 = arith.mulf %230, %215 : vector<8x128xf32>
    %234 = arith.subf %232, %233 : vector<8x128xf32>
    %235 = arith.cmpf ogt, %234, %230 : vector<8x128xf32>
    %236 = arith.extui %235 : vector<8x128xi1> to vector<8x128xi32>
    %237 = arith.sitofp %236 : vector<8x128xi32> to vector<8x128xf32>
    %238 = arith.index_cast %221 : i32 to index
    %c0_79 = arith.constant 0 : index
    %239 = vector.load %arg10[%238, %c0_79] : memref<128x128xf32, #tpu.memory_space<vmem>>, vector<8x128xf32>
    tpu.vector_store %arg10[%238, %c0_79], %234 {strides = array<i32>} : memref<128x128xf32, #tpu.memory_space<vmem>>, vector<8x128xf32>,
    %240 = arith.index_cast %221 : i32 to index
    %c0_80 = arith.constant 0 : index
    %241 = vector.load %arg11[%240, %c0_80] : memref<128x128xf32, #tpu.memory_space<vmem>>, vector<8x128xf32>
    tpu.vector_store %arg11[%240, %c0_80], %237 {strides = array<i32>} : memref<128x128xf32, #tpu.memory_space<vmem>>, vector<8x128xf32>,
    %c10_i32 = arith.constant 10 : i32
    %c8_i32_81 = arith.constant 8 : i32
    %242 = arith.muli %c10_i32, %c8_i32_81 : i32
    %243 = tpu.assume_multiple %242, 8 : i32
    %244 = arith.index_cast %243 : i32 to index
    %c0_82 = arith.constant 0 : index
    %245 = vector.load %arg13[%244, %c0_82] : memref<128x128xf32, #tpu.memory_space<vmem>>, vector<8x128xf32>
    %246 = arith.mulf %15, %226 : vector<8x128xf32>
    %247 = arith.mulf %18, %237 : vector<8x128xf32>
    %248 = arith.addf %246, %247 : vector<8x128xf32>
    %cst_83 = arith.constant 1.800000e+00 : f32
    %249 = vector.broadcast %cst_83 : f32 to vector<8x128xf32>
    %250 = arith.mulf %249, %248 : vector<8x128xf32>
    %cst_84 = arith.constant 1.600000e+00 : f32
    %251 = vector.broadcast %cst_84 : f32 to vector<8x128xf32>
    %252 = arith.addf %251, %250 : vector<8x128xf32>
    %253 = arith.mulf %234, %12 : vector<8x128xf32>
    %254 = arith.addf %253, %245 : vector<8x128xf32>
    %255 = arith.mulf %252, %237 : vector<8x128xf32>
    %256 = arith.subf %254, %255 : vector<8x128xf32>
    %257 = arith.cmpf ogt, %256, %252 : vector<8x128xf32>
    %258 = arith.extui %257 : vector<8x128xi1> to vector<8x128xi32>
    %259 = arith.sitofp %258 : vector<8x128xi32> to vector<8x128xf32>
    %260 = arith.index_cast %243 : i32 to index
    %c0_85 = arith.constant 0 : index
    %261 = vector.load %arg10[%260, %c0_85] : memref<128x128xf32, #tpu.memory_space<vmem>>, vector<8x128xf32>
    tpu.vector_store %arg10[%260, %c0_85], %256 {strides = array<i32>} : memref<128x128xf32, #tpu.memory_space<vmem>>, vector<8x128xf32>,
    %262 = arith.index_cast %243 : i32 to index
    %c0_86 = arith.constant 0 : index
    %263 = vector.load %arg11[%262, %c0_86] : memref<128x128xf32, #tpu.memory_space<vmem>>, vector<8x128xf32>
    tpu.vector_store %arg11[%262, %c0_86], %259 {strides = array<i32>} : memref<128x128xf32, #tpu.memory_space<vmem>>, vector<8x128xf32>,
    %c11_i32 = arith.constant 11 : i32
    %c8_i32_87 = arith.constant 8 : i32
    %264 = arith.muli %c11_i32, %c8_i32_87 : i32
    %265 = tpu.assume_multiple %264, 8 : i32
    %266 = arith.index_cast %265 : i32 to index
    %c0_88 = arith.constant 0 : index
    %267 = vector.load %arg13[%266, %c0_88] : memref<128x128xf32, #tpu.memory_space<vmem>>, vector<8x128xf32>
    %268 = arith.mulf %15, %248 : vector<8x128xf32>
    %269 = arith.mulf %18, %259 : vector<8x128xf32>
    %270 = arith.addf %268, %269 : vector<8x128xf32>
    %cst_89 = arith.constant 1.800000e+00 : f32
    %271 = vector.broadcast %cst_89 : f32 to vector<8x128xf32>
    %272 = arith.mulf %271, %270 : vector<8x128xf32>
    %cst_90 = arith.constant 1.600000e+00 : f32
    %273 = vector.broadcast %cst_90 : f32 to vector<8x128xf32>
    %274 = arith.addf %273, %272 : vector<8x128xf32>
    %275 = arith.mulf %256, %12 : vector<8x128xf32>
    %276 = arith.addf %275, %267 : vector<8x128xf32>
    %277 = arith.mulf %274, %259 : vector<8x128xf32>
    %278 = arith.subf %276, %277 : vector<8x128xf32>
    %279 = arith.cmpf ogt, %278, %274 : vector<8x128xf32>
    %280 = arith.extui %279 : vector<8x128xi1> to vector<8x128xi32>
    %281 = arith.sitofp %280 : vector<8x128xi32> to vector<8x128xf32>
    %282 = arith.index_cast %265 : i32 to index
    %c0_91 = arith.constant 0 : index
    %283 = vector.load %arg10[%282, %c0_91] : memref<128x128xf32, #tpu.memory_space<vmem>>, vector<8x128xf32>
    tpu.vector_store %arg10[%282, %c0_91], %278 {strides = array<i32>} : memref<128x128xf32, #tpu.memory_space<vmem>>, vector<8x128xf32>,
    %284 = arith.index_cast %265 : i32 to index
    %c0_92 = arith.constant 0 : index
    %285 = vector.load %arg11[%284, %c0_92] : memref<128x128xf32, #tpu.memory_space<vmem>>, vector<8x128xf32>
    tpu.vector_store %arg11[%284, %c0_92], %281 {strides = array<i32>} : memref<128x128xf32, #tpu.memory_space<vmem>>, vector<8x128xf32>,
    %c12_i32 = arith.constant 12 : i32
    %c8_i32_93 = arith.constant 8 : i32
    %286 = arith.muli %c12_i32, %c8_i32_93 : i32
    %287 = tpu.assume_multiple %286, 8 : i32
    %288 = arith.index_cast %287 : i32 to index
    %c0_94 = arith.constant 0 : index
    %289 = vector.load %arg13[%288, %c0_94] : memref<128x128xf32, #tpu.memory_space<vmem>>, vector<8x128xf32>
    %290 = arith.mulf %15, %270 : vector<8x128xf32>
    %291 = arith.mulf %18, %281 : vector<8x128xf32>
    %292 = arith.addf %290, %291 : vector<8x128xf32>
    %cst_95 = arith.constant 1.800000e+00 : f32
    %293 = vector.broadcast %cst_95 : f32 to vector<8x128xf32>
    %294 = arith.mulf %293, %292 : vector<8x128xf32>
    %cst_96 = arith.constant 1.600000e+00 : f32
    %295 = vector.broadcast %cst_96 : f32 to vector<8x128xf32>
    %296 = arith.addf %295, %294 : vector<8x128xf32>
    %297 = arith.mulf %278, %12 : vector<8x128xf32>
    %298 = arith.addf %297, %289 : vector<8x128xf32>
    %299 = arith.mulf %296, %281 : vector<8x128xf32>
    %300 = arith.subf %298, %299 : vector<8x128xf32>
    %301 = arith.cmpf ogt, %300, %296 : vector<8x128xf32>
    %302 = arith.extui %301 : vector<8x128xi1> to vector<8x128xi32>
    %303 = arith.sitofp %302 : vector<8x128xi32> to vector<8x128xf32>
    %304 = arith.index_cast %287 : i32 to index
    %c0_97 = arith.constant 0 : index
    %305 = vector.load %arg10[%304, %c0_97] : memref<128x128xf32, #tpu.memory_space<vmem>>, vector<8x128xf32>
    tpu.vector_store %arg10[%304, %c0_97], %300 {strides = array<i32>} : memref<128x128xf32, #tpu.memory_space<vmem>>, vector<8x128xf32>,
    %306 = arith.index_cast %287 : i32 to index
    %c0_98 = arith.constant 0 : index
    %307 = vector.load %arg11[%306, %c0_98] : memref<128x128xf32, #tpu.memory_space<vmem>>, vector<8x128xf32>
    tpu.vector_store %arg11[%306, %c0_98], %303 {strides = array<i32>} : memref<128x128xf32, #tpu.memory_space<vmem>>, vector<8x128xf32>,
    %c13_i32 = arith.constant 13 : i32
    %c8_i32_99 = arith.constant 8 : i32
    %308 = arith.muli %c13_i32, %c8_i32_99 : i32
    %309 = tpu.assume_multiple %308, 8 : i32
    %310 = arith.index_cast %309 : i32 to index
    %c0_100 = arith.constant 0 : index
    %311 = vector.load %arg13[%310, %c0_100] : memref<128x128xf32, #tpu.memory_space<vmem>>, vector<8x128xf32>
    %312 = arith.mulf %15, %292 : vector<8x128xf32>
    %313 = arith.mulf %18, %303 : vector<8x128xf32>
    %314 = arith.addf %312, %313 : vector<8x128xf32>
    %cst_101 = arith.constant 1.800000e+00 : f32
    %315 = vector.broadcast %cst_101 : f32 to vector<8x128xf32>
    %316 = arith.mulf %315, %314 : vector<8x128xf32>
    %cst_102 = arith.constant 1.600000e+00 : f32
    %317 = vector.broadcast %cst_102 : f32 to vector<8x128xf32>
    %318 = arith.addf %317, %316 : vector<8x128xf32>
    %319 = arith.mulf %300, %12 : vector<8x128xf32>
    %320 = arith.addf %319, %311 : vector<8x128xf32>
    %321 = arith.mulf %318, %303 : vector<8x128xf32>
    %322 = arith.subf %320, %321 : vector<8x128xf32>
    %323 = arith.cmpf ogt, %322, %318 : vector<8x128xf32>
    %324 = arith.extui %323 : vector<8x128xi1> to vector<8x128xi32>
    %325 = arith.sitofp %324 : vector<8x128xi32> to vector<8x128xf32>
    %326 = arith.index_cast %309 : i32 to index
    %c0_103 = arith.constant 0 : index
    %327 = vector.load %arg10[%326, %c0_103] : memref<128x128xf32, #tpu.memory_space<vmem>>, vector<8x128xf32>
    tpu.vector_store %arg10[%326, %c0_103], %322 {strides = array<i32>} : memref<128x128xf32, #tpu.memory_space<vmem>>, vector<8x128xf32>,
    %328 = arith.index_cast %309 : i32 to index
    %c0_104 = arith.constant 0 : index
    %329 = vector.load %arg11[%328, %c0_104] : memref<128x128xf32, #tpu.memory_space<vmem>>, vector<8x128xf32>
    tpu.vector_store %arg11[%328, %c0_104], %325 {strides = array<i32>} : memref<128x128xf32, #tpu.memory_space<vmem>>, vector<8x128xf32>,
    %c14_i32 = arith.constant 14 : i32
    %c8_i32_105 = arith.constant 8 : i32
    %330 = arith.muli %c14_i32, %c8_i32_105 : i32
    %331 = tpu.assume_multiple %330, 8 : i32
    %332 = arith.index_cast %331 : i32 to index
    %c0_106 = arith.constant 0 : index
    %333 = vector.load %arg13[%332, %c0_106] : memref<128x128xf32, #tpu.memory_space<vmem>>, vector<8x128xf32>
    %334 = arith.mulf %15, %314 : vector<8x128xf32>
    %335 = arith.mulf %18, %325 : vector<8x128xf32>
    %336 = arith.addf %334, %335 : vector<8x128xf32>
    %cst_107 = arith.constant 1.800000e+00 : f32
    %337 = vector.broadcast %cst_107 : f32 to vector<8x128xf32>
    %338 = arith.mulf %337, %336 : vector<8x128xf32>
    %cst_108 = arith.constant 1.600000e+00 : f32
    %339 = vector.broadcast %cst_108 : f32 to vector<8x128xf32>
    %340 = arith.addf %339, %338 : vector<8x128xf32>
    %341 = arith.mulf %322, %12 : vector<8x128xf32>
    %342 = arith.addf %341, %333 : vector<8x128xf32>
    %343 = arith.mulf %340, %325 : vector<8x128xf32>
    %344 = arith.subf %342, %343 : vector<8x128xf32>
    %345 = arith.cmpf ogt, %344, %340 : vector<8x128xf32>
    %346 = arith.extui %345 : vector<8x128xi1> to vector<8x128xi32>
    %347 = arith.sitofp %346 : vector<8x128xi32> to vector<8x128xf32>
    %348 = arith.index_cast %331 : i32 to index
    %c0_109 = arith.constant 0 : index
    %349 = vector.load %arg10[%348, %c0_109] : memref<128x128xf32, #tpu.memory_space<vmem>>, vector<8x128xf32>
    tpu.vector_store %arg10[%348, %c0_109], %344 {strides = array<i32>} : memref<128x128xf32, #tpu.memory_space<vmem>>, vector<8x128xf32>,
    %350 = arith.index_cast %331 : i32 to index
    %c0_110 = arith.constant 0 : index
    %351 = vector.load %arg11[%350, %c0_110] : memref<128x128xf32, #tpu.memory_space<vmem>>, vector<8x128xf32>
    tpu.vector_store %arg11[%350, %c0_110], %347 {strides = array<i32>} : memref<128x128xf32, #tpu.memory_space<vmem>>, vector<8x128xf32>,
    %c15_i32 = arith.constant 15 : i32
    %c8_i32_111 = arith.constant 8 : i32
    %352 = arith.muli %c15_i32, %c8_i32_111 : i32
    %353 = tpu.assume_multiple %352, 8 : i32
    %354 = arith.index_cast %353 : i32 to index
    %c0_112 = arith.constant 0 : index
    %355 = vector.load %arg13[%354, %c0_112] : memref<128x128xf32, #tpu.memory_space<vmem>>, vector<8x128xf32>
    %356 = arith.mulf %15, %336 : vector<8x128xf32>
    %357 = arith.mulf %18, %347 : vector<8x128xf32>
    %358 = arith.addf %356, %357 : vector<8x128xf32>
    %cst_113 = arith.constant 1.800000e+00 : f32
    %359 = vector.broadcast %cst_113 : f32 to vector<8x128xf32>
    %360 = arith.mulf %359, %358 : vector<8x128xf32>
    %cst_114 = arith.constant 1.600000e+00 : f32
    %361 = vector.broadcast %cst_114 : f32 to vector<8x128xf32>
    %362 = arith.addf %361, %360 : vector<8x128xf32>
    %363 = arith.mulf %344, %12 : vector<8x128xf32>
    %364 = arith.addf %363, %355 : vector<8x128xf32>
    %365 = arith.mulf %362, %347 : vector<8x128xf32>
    %366 = arith.subf %364, %365 : vector<8x128xf32>
    %367 = arith.cmpf ogt, %366, %362 : vector<8x128xf32>
    %368 = arith.extui %367 : vector<8x128xi1> to vector<8x128xi32>
    %369 = arith.sitofp %368 : vector<8x128xi32> to vector<8x128xf32>
    %370 = arith.index_cast %353 : i32 to index
    %c0_115 = arith.constant 0 : index
    %371 = vector.load %arg10[%370, %c0_115] : memref<128x128xf32, #tpu.memory_space<vmem>>, vector<8x128xf32>
    tpu.vector_store %arg10[%370, %c0_115], %366 {strides = array<i32>} : memref<128x128xf32, #tpu.memory_space<vmem>>, vector<8x128xf32>,
    %372 = arith.index_cast %353 : i32 to index
    %c0_116 = arith.constant 0 : index
    %373 = vector.load %arg11[%372, %c0_116] : memref<128x128xf32, #tpu.memory_space<vmem>>, vector<8x128xf32>
    tpu.vector_store %arg11[%372, %c0_116], %369 {strides = array<i32>} : memref<128x128xf32, #tpu.memory_space<vmem>>, vector<8x128xf32>,
    %c16_i32 = arith.constant 16 : i32
    %c0_117 = arith.constant 0 : index
    %c0_118 = arith.constant 0 : index
    %374 = vector.load %arg14[%c0_117, %c0_118] : memref<8x128xf32, #tpu.memory_space<vmem>>, vector<8x128xf32>
    tpu.vector_store %arg14[%c0_117, %c0_118], %366 {strides = array<i32>} : memref<8x128xf32, #tpu.memory_space<vmem>>, vector<8x128xf32>,
    %c0_119 = arith.constant 0 : index
    %c0_120 = arith.constant 0 : index
    %375 = vector.load %arg15[%c0_119, %c0_120] : memref<8x128xf32, #tpu.memory_space<vmem>>, vector<8x128xf32>
    tpu.vector_store %arg15[%c0_119, %c0_120], %369 {strides = array<i32>} : memref<8x128xf32, #tpu.memory_space<vmem>>, vector<8x128xf32>,
    %c0_121 = arith.constant 0 : index
    %c0_122 = arith.constant 0 : index
    %376 = vector.load %arg16[%c0_121, %c0_122] : memref<8x128xf32, #tpu.memory_space<vmem>>, vector<8x128xf32>
    tpu.vector_store %arg16[%c0_121, %c0_122], %358 {strides = array<i32>} : memref<8x128xf32, #tpu.memory_space<vmem>>, vector<8x128xf32>,
    %c0_i32_123 = arith.constant 0 : i32
    %377 = arith.cmpi eq, %arg0, %c0_i32_123 : i32
    %378 = arith.extui %377 : i1 to i32
    %c0_i32_124 = arith.constant 0 : i32
    %379 = arith.cmpi ne, %378, %c0_i32_124 : i32
    scf.if %379 {
      %c0_125 = arith.constant 0 : index
      %c0_126 = arith.constant 0 : index
      %380 = vector.load %arg12[%c0_125, %c0_126] : memref<8x128xf32, #tpu.memory_space<vmem>>, vector<8x128xf32>
      tpu.vector_store %arg12[%c0_125, %c0_126], %358 {strides = array<i32>} : memref<8x128xf32, #tpu.memory_space<vmem>>, vector<8x128xf32>,
    } else {
    }
    return
  }
  func.func @transform_0(%arg0: i32) -> (i32, i32) {
    %c0_i32 = arith.constant 0 : i32
    %c0_i32_0 = arith.constant 0 : i32
    return %arg0, %c0_i32 : i32, i32
  }
  func.func @transform_1(%arg0: i32) -> (i32, i32) {
    %c0_i32 = arith.constant 0 : i32
    %c0_i32_0 = arith.constant 0 : i32
    %c0_i32_1 = arith.constant 0 : i32
    return %c0_i32, %c0_i32_0 : i32, i32
  }
  func.func @transform_2(%arg0: i32) -> (i32, i32) {
    %c0_i32 = arith.constant 0 : i32
    %c0_i32_0 = arith.constant 0 : i32
    %c0_i32_1 = arith.constant 0 : i32
    return %c0_i32, %c0_i32_0 : i32, i32
  }
  func.func @transform_3(%arg0: i32) -> (i32, i32) {
    %c0_i32 = arith.constant 0 : i32
    %c0_i32_0 = arith.constant 0 : i32
    %c0_i32_1 = arith.constant 0 : i32
    return %c0_i32, %c0_i32_0 : i32, i32
  }
  func.func @transform_4(%arg0: i32) -> (i32, i32) {
    %c0_i32 = arith.constant 0 : i32
    %c0_i32_0 = arith.constant 0 : i32
    %c0_i32_1 = arith.constant 0 : i32
    return %c0_i32, %c0_i32_0 : i32, i32
  }
  func.func @transform_5(%arg0: i32) -> (i32, i32) {
    %c0_i32 = arith.constant 0 : i32
    %c0_i32_0 = arith.constant 0 : i32
    %c0_i32_1 = arith.constant 0 : i32
    return %c0_i32, %c0_i32_0 : i32, i32
  }
  func.func @transform_6(%arg0: i32) -> (i32, i32) {
    %c0_i32 = arith.constant 0 : i32
    %c0_i32_0 = arith.constant 0 : i32
    %c0_i32_1 = arith.constant 0 : i32
    return %c0_i32, %c0_i32_0 : i32, i32
  }
  func.func @transform_7(%arg0: i32) -> (i32, i32) {
    %c0_i32 = arith.constant 0 : i32
    %c0_i32_0 = arith.constant 0 : i32
    %c0_i32_1 = arith.constant 0 : i32
    return %c0_i32, %c0_i32_0 : i32, i32
  }
  func.func @transform_8(%arg0: i32) -> (i32, i32) {
    %c0_i32 = arith.constant 0 : i32
    %c0_i32_0 = arith.constant 0 : i32
    %c0_i32_1 = arith.constant 0 : i32
    return %c0_i32, %c0_i32_0 : i32, i32
  }
  func.func @transform_9(%arg0: i32) -> (i32, i32) {
    %c0_i32 = arith.constant 0 : i32
    %c0_i32_0 = arith.constant 0 : i32
    return %arg0, %c0_i32 : i32, i32
  }
  func.func @transform_10(%arg0: i32) -> (i32, i32) {
    %c0_i32 = arith.constant 0 : i32
    %c0_i32_0 = arith.constant 0 : i32
    return %arg0, %c0_i32 : i32, i32
  }
  func.func @transform_11(%arg0: i32) -> (i32, i32) {
    %c0_i32 = arith.constant 0 : i32
    %c0_i32_0 = arith.constant 0 : i32
    %c0_i32_1 = arith.constant 0 : i32
    return %c0_i32, %c0_i32_0 : i32, i32
  }
}

</mosaic_0001>

<bundles_post_ra>
// kernel: tpu_custom_call.1
= control target key start
LH: loop header
LB: loop body
LE: loop exit
PB: predicated region body
PF: predicated region fallthrough
CT: control target
= control target key end

     0   :  { %17 = vsyncpa [#allocation7], 0  ;;  %vm68_vm0 = vcmask 523264   ;;  %s1195_s0 = inlined_call_operand.vmem [shape: f32[128,64], index: 0, kind: input, shape index: {}]   ;;  %s1196_s1 = inlined_call_operand.vmem [shape: f32[64,128], index: 1, kind: input, shape index: {}]   ;;  %s1197_s2 = inlined_call_operand.vmem [shape: f32[1,128], index: 2, kind: input, shape index: {}]   ;;  %s1198_s3 = inlined_call_operand.vmem [shape: f32[1,128], index: 3, kind: input, shape index: {}]   ;;  %s1199_s4 = inlined_call_operand.vmem [shape: f32[1,128], index: 4, kind: input, shape index: {}]   ;;  %s1200_s5 = inlined_call_operand.vmem [shape: f32[1,128], index: 5, kind: input, shape index: {}]   ;;  %s1201_s6 = inlined_call_operand.vmem [shape: f32[8,128], index: 6, kind: input, shape index: {}]   ;;  %s1202_s7 = inlined_call_operand.vmem [shape: f32[8,128], index: 7, kind: input, shape index: {}]   ;;  %s1203_s8 = inlined_call_operand.vmem [shape: f32[8,128], index: 8, kind: input, shape index: {}]   ;;  %s1204_s9 = inlined_call_operand.hbm [shape: f32[128,128], index: 9, kind: output, shape index: {0}]   ;;  %s1205_s10 = inlined_call_operand.hbm [shape: f32[128,128], index: 10, kind: output, shape index: {1}]   ;;  %s1206_s11 = inlined_call_operand.hbm [shape: f32[8,128], index: 11, kind: output, shape index: {2}]  }
   0x1   :  { %v53_v0 = vld [vmem:[%s1196_s1] sm:$0xff]  ;;  %v54_v1 = vld [vmem:[%s1196_s1 + $0x8] sm:$0xff]  ;;  %v55_v2 = vld [vmem:[%s1196_s1 + $0x10] sm:$0xff] }
   0x2   :  { %v749_v3 = vpack.c.bf16 %v54_v1, %v53_v0  ;;  %v56_v4 = vld [vmem:[%s1196_s1 + $0x18] sm:$0xff]  ;;  %v57_v6 = vld [vmem:[%s1196_s1 + $0x20] sm:$0xff]  ;;  %v58_v7 = vld [vmem:[%s1196_s1 + $0x28] sm:$0xff] }
   0x3   :  { %v753_v5 = vpack.c.bf16 %v56_v4, %v55_v2  ;;  %v37_v8 = vld [vmem:[%s1195_s0] sm:$0xff]  ;;  %v757_v9 = vpack.c.bf16 %v58_v7, %v57_v6  ;;  %v59_v11 = vld [vmem:[%s1196_s1 + $0x30] sm:$0xff]  ;;  %v60_v12 = vld [vmem:[%s1196_s1 + $0x38] sm:$0xff] }
   0x4   :  { %750 = vmatprep.subr.bf16.mxu0 %v749_v3  ;;  %725 = vmatprep.mubr.msk.f32.mxu0 %vm68_vm0, %v37_v8  ;;  %v45_v10 = vld [vmem:[%s1195_s0 + $0x40] sm:$0xff] }
   0x5   :  { %752 = vmatpush3.bf16.msra.mxu0 %v749_v3  ;;  %765 = vmatprep.subr.bf16.mxu1 %v749_v3 }
   0x6   :  { %754 = vmatprep.subr.bf16.mxu0 %v753_v5  ;;  %769 = vmatpush3.bf16.msra.mxu1 %v749_v3 }
   0x7   :  { %766 = vmatprep.subr.bf16.mxu1 %v753_v5  ;;  %737 = vmatprep.mubr.msk.f32.mxu1 %vm68_vm0, %v45_v10 }
   0x9   :  { %756 = vmatpush3.bf16.msra.mxu0 %v753_v5 }
   0xa   :  { %18 = vsyncpa [#allocation9], 0  ;;  %758 = vmatprep.subr.bf16.mxu0 %v757_v9  ;;  %v761_v13 = vpack.c.bf16 %v60_v12, %v59_v11  ;;  %770 = vmatpush3.bf16.msra.mxu1 %v753_v5  ;;  %v38_v14 = vld [vmem:[%s1195_s0 + $0x8] sm:$0xff]  ;;  %v39_v15 = vld [vmem:[%s1195_s0 + $0x10] sm:$0xff]  ;;  %v849_v61 = vmov 0.0   ;;  %s852_s16 = smov [#allocation10]  }
   0xb   :  { %767 = vmatprep.subr.bf16.mxu1 %v757_v9  ;;  %v46_v16 = vld [vmem:[%s1195_s0 + $0x48] sm:$0xff]  ;;  %v47_v17 = vld [vmem:[%s1195_s0 + $0x50] sm:$0xff]  ;;  %v40_v18 = vld [vmem:[%s1195_s0 + $0x18] sm:$0xff]  ;;  %s634_s17 = sshll.u32 %s852_s16, 4  ;;  %s1146_s17 = int_to_ptr.vmem [resolvable:$true] %s634_s17 }
   0xc   :  { %v41_v19 = vld [vmem:[%s1195_s0 + $0x20] sm:$0xff]  ;;  %v48_v20 = vld [vmem:[%s1195_s0 + $0x58] sm:$0xff]  ;;  %v42_v22 = vld [vmem:[%s1195_s0 + $0x28] sm:$0xff] }
   0xd   :  { %760 = vmatpush3.bf16.msra.mxu0 %v757_v9  ;;  %v49_v21 = vld [vmem:[%s1195_s0 + $0x60] sm:$0xff]  ;;  %v43_v23 = vld [vmem:[%s1195_s0 + $0x30] sm:$0xff]  ;;  %v50_v24 = vld [vmem:[%s1195_s0 + $0x68] sm:$0xff] }
   0xe   :  { %762 = vmatprep.subr.bf16.mxu0 %v761_v13  ;;  %771 = vmatpush3.bf16.msra.mxu1 %v757_v9  ;;  %v51_v25 = vld [vmem:[%s1195_s0 + $0x70] sm:$0xff]  ;;  %v44_v26 = vld [vmem:[%s1195_s0 + $0x38] sm:$0xff]  ;;  %v284_v28 = vld [vmem:[%s1202_s7] sm:$0xff] }
   0xf   :  { %768 = vmatprep.subr.bf16.mxu1 %v761_v13  ;;  %v52_v27 = vld [vmem:[%s1195_s0 + $0x78] sm:$0xff]  ;;  %v286_v29 = vld [vmem:[%s1203_s8] sm:$0xff] }
  0x10   :  { %v1012_v30 = vld [vmem:[%s1199_s4] ss:$0 sm:$0xff] }
  0x11   :  { %764 = vmatpush3.bf16.msra.mxu0 %v761_v13  ;;  %v1017_v31 = vld [vmem:[%s1200_s5] ss:$0 sm:$0xff]  ;;  %v313_v32 = vmul.f32 %v1012_v30, %v286_v29  ;;  %s851_s5 = smov [#allocation8]  }
  0x12   :  { %772 = vmatpush3.bf16.msra.mxu1 %v761_v13  ;;  %v314_v33 = vmul.f32 %v1017_v31, %v284_v28  ;;  %v282_v36 = vld [vmem:[%s1201_s6] sm:$0xff]  ;;  %s621_s6 = sshll.u32 %s851_s5, 4  ;;  %s1144_s6 = int_to_ptr.vmem [resolvable:$true] %s621_s6 }
  0x13   :  { %v1027_v37 = vld [vmem:[%s1198_s3] ss:$0 sm:$0xff] }
  0x14   :  { %726 = vmatmul.mubr.msk.f32.vlgmr.msra.gmra.mrb[0].mxu0 %vm68_vm0, %v38_v14  ;;  %v315_v34 = vadd.f32 %v314_v33, %v313_v32  ;;  %v1032_v39 = vld [vmem:[%s1197_s2] ss:$0 sm:$0xff]  ;;  %v318_v41 = vmul.f32 %v1027_v37, %v282_v36  ;;  %s850_s2 = smov [#allocation6]  }
  0x15   :  { %728 = vmatprep.mubr.msk.f32.mxu0 %vm68_vm0, %v39_v15  ;;  %738 = vmatmul.mubr.msk.f32.vlgmr.msra.gmra.mrb[0].mxu1 %vm68_vm0, %v46_v16  ;;  %s609_s3 = sshll.u32 %s850_s2, 4  ;;  %s610_s3 = int_to_ptr.vmem [resolvable:$true] %s609_s3 }
  0x16   :  { %740 = vmatprep.mubr.msk.f32.mxu1 %vm68_vm0, %v47_v17  ;;  %v316_v35 = vmul.f32 1.8, %v315_v34  ;;  %v329_v58 = vmul.f32 %v1012_v30, %v315_v34  ;;  %s779_s18 = scalar_lea.vmem %s610_s3, 2048  ;;  %p784_p1 = scmp.lt.s32.totalorder %s610_s3, %s610_s3 }
  0x17   :  { %p780_p0 = scmp.ne.s32.totalorder %s610_s3, %s779_s18  ;;  %p785_p2 = scmp.lt.s32.totalorder %s779_s18, %s779_s18 }
  0x18   :  { %729 = vmatmul.mubr.msk.f32.gmra.mrb[2].mxu0 %vm68_vm0, %v40_v18  ;;  %v317_v38 = vadd.f32 1.6, %v316_v35 }
  0x19   :  { %731 = vmatprep.mubr.msk.f32.mxu0 %vm68_vm0, %v41_v19  ;;  %741 = vmatmul.mubr.msk.f32.gmra.mrb[2].mxu1 %vm68_vm0, %v48_v20  ;;  %p786_p3 = por %p785_p2, %p784_p1 }
  0x1a   :  { %743 = vmatprep.mubr.msk.f32.mxu1 %vm68_vm0, %v49_v21  ;;  %v320_v45 = vmul.f32 %v317_v38, %v284_v28 }
  0x1b   :  { %p787_p4 = pnand %p786_p3, %p780_p0 }
  0x1c   :  { %732 = vmatmul.mubr.msk.f32.gmra.mrb[4].mxu0 %vm68_vm0, %v42_v22 }
  0x1d   :  { %734 = vmatprep.mubr.msk.f32.mxu0 %vm68_vm0, %v43_v23  ;;  %744 = vmatmul.mubr.msk.f32.gmra.mrb[4].mxu1 %vm68_vm0, %v50_v24 }
  0x1e   :  { %746 = vmatprep.mubr.msk.f32.mxu1 %vm68_vm0, %v51_v25 }
  0x20   :  { %735 = vmatmul.mubr.msk.f32.gmra.mrb[6].mxu0 %vm68_vm0, %v44_v26 }
  0x21   :  { %747 = vmatmul.mubr.msk.f32.gmra.mrb[6].mxu1 %vm68_vm0, %v52_v27 }
  0xe7   :  { %v727_v40 = vpop.f32.mrb[0].mxu0 }
  0xe8   :  { %v183_v42 = vpop.f32.mrb[1].mxu0  ;;  %v739_v43 = vpop.f32.mrb[0].mxu1  ;;  %v189_v57 = vadd.f32 %v727_v40, %v1032_v39 }
  0xe9   :  { %v184_v44 = vadd.f32 %v1032_v39, %v183_v42  ;;  %v1037_v46 = vadd.f32 %v739_v43, %v1032_v39  ;;  %v223_v47 = vpop.f32.mrb[1].mxu1 }
  0xea   :  { %v1040_v48 = vadd.f32 %v1032_v39, %v223_v47 }
  0xeb   :  { %v319_v49 = vadd.f32 %v318_v41, %v184_v44  ;;  %v730_v50 = vpop.f32.mrb[2].mxu0 }
  0xec   :  { %v193_v51 = vpop.f32.mrb[3].mxu0  ;;  %v742_v52 = vpop.f32.mrb[2].mxu1  ;;  %v199_v27 = vadd.f32 %v730_v50, %v1032_v39 }
  0xed   :  { %v321_v53 = vsub.f32 %v319_v49, %v320_v45  ;;  %v1043_v54 = vadd.f32 %v742_v52, %v1032_v39  ;;  %v233_v55 = vpop.f32.mrb[3].mxu1  ;;  %v194_v11 = vadd.f32 %v1032_v39, %v193_v51 }
  0xee   :  { %v1046_v56 = vadd.f32 %v1032_v39, %v233_v55 }
  0xef   :  { %vm322_vm1 = vcmp.gt.f32.partialorder %v321_v53, %v317_v38  ;;  %325 = vst [vmem:[#allocation6] sm:$0xff] %v321_v53  ;;  %v334_v59 = vmul.f32 %v1027_v37, %v321_v53  ;;  %v733_v60 = vpop.f32.mrb[4].mxu0 }
  0xf0   :  { %v669_v62 = vsel %vm322_vm1, 1.0, %v849_v61  ;;  %v1053_v63 = vadd.f32 %v733_v60, %v1032_v39  ;;  %v203_v0 = vpop.f32.mrb[5].mxu0  ;;  %v745_v14 = vpop.f32.mrb[4].mxu1 }
  0xf1   :  { %326 = vst [vmem:[#allocation8] sm:$0xff] %v669_v62  ;;  %v330_v1 = vmul.f32 %v669_v62, %v1017_v31  ;;  %v335_v2 = vadd.f32 %v334_v59, %v189_v57  ;;  %v1066_v16 = vadd.f32 %v745_v14, %v1032_v39  ;;  %v243_v17 = vpop.f32.mrb[5].mxu1  ;;  %v204_v41 = vadd.f32 %v1032_v39, %v203_v0 }
  0xf2   :  { %v1071_v21 = vadd.f32 %v1032_v39, %v243_v17 }
  0xf3   :  { %v331_v3 = vadd.f32 %v330_v1, %v329_v58  ;;  %v736_v4 = vpop.f32.mrb[6].mxu0 }
  0xf4   :  { %v1057_v5 = vadd.f32 %v736_v4, %v1032_v39  ;;  %v213_v6 = vpop.f32.mrb[7].mxu0  ;;  %v748_v44 = vpop.f32.mrb[6].mxu1 }
  0xf5   :  { %v332_v7 = vmul.f32 1.8, %v331_v3  ;;  %v1060_v8 = vadd.f32 %v1032_v39, %v213_v6  ;;  %v347_v18 = vmul.f32 %v1012_v30, %v331_v3  ;;  %v1082_v47 = vadd.f32 %v748_v44, %v1032_v39  ;;  %v253_v49 = vpop.f32.mrb[7].mxu1 }
  0xf6   :  { %v1087_v53 = vadd.f32 %v1032_v39, %v253_v49 }
  0xf7   :  { %v333_v9 = vadd.f32 1.6, %v332_v7 }
  0xf9   :  { %v336_v10 = vmul.f32 %v669_v62, %v333_v9 }
  0xfb   :  { %v337_v12 = vsub.f32 %v335_v2, %v336_v10 }
  0xfd   :  { %vm338_vm2 = vcmp.gt.f32.partialorder %v337_v12, %v333_v9  ;;  %342 = vst [vmem:[#allocation6 + $0x8] sm:$0xff] %v337_v12  ;;  %v352_v13 = vmul.f32 %v1027_v37, %v337_v12 }
  0xfe   :  { %v670_v15 = vsel %vm338_vm2, 1.0, %v849_v61 }
  0xff   :  { %344 = vst [vmem:[#allocation8 + $0x8] sm:$0xff] %v670_v15  ;;  %v348_v19 = vmul.f32 %v670_v15, %v1017_v31  ;;  %v353_v20 = vadd.f32 %v352_v13, %v194_v11 }
 0x101   :  { %v349_v22 = vadd.f32 %v348_v19, %v347_v18 }
 0x103   :  { %v350_v23 = vmul.f32 1.8, %v349_v22  ;;  %v365_v32 = vmul.f32 %v1012_v30, %v349_v22 }
 0x105   :  { %v351_v24 = vadd.f32 1.6, %v350_v23 }
 0x107   :  { %v354_v25 = vmul.f32 %v670_v15, %v351_v24 }
 0x109   :  { %v355_v26 = vsub.f32 %v353_v20, %v354_v25 }
 0x10b   :  { %vm356_vm3 = vcmp.gt.f32.partialorder %v355_v26, %v351_v24  ;;  %360 = vst [vmem:[#allocation6 + $0x10] sm:$0xff] %v355_v26  ;;  %v370_v28 = vmul.f32 %v1027_v37, %v355_v26 }
 0x10c   :  { %v671_v29 = vsel %vm356_vm3, 1.0, %v849_v61 }
 0x10d   :  { %362 = vst [vmem:[#allocation8 + $0x10] sm:$0xff] %v671_v29  ;;  %v366_v33 = vmul.f32 %v671_v29, %v1017_v31  ;;  %v371_v34 = vadd.f32 %v370_v28, %v199_v27 }
 0x10f   :  { %v367_v35 = vadd.f32 %v366_v33, %v365_v32 }
 0x111   :  { %v368_v36 = vmul.f32 1.8, %v367_v35  ;;  %v383_v50 = vmul.f32 %v1012_v30, %v367_v35 }
 0x113   :  { %v369_v38 = vadd.f32 1.6, %v368_v36 }
 0x115   :  { %v372_v40 = vmul.f32 %v671_v29, %v369_v38 }
 0x117   :  { %v373_v42 = vsub.f32 %v371_v34, %v372_v40 }
 0x119   :  { %vm374_vm4 = vcmp.gt.f32.partialorder %v373_v42, %v369_v38  ;;  %378 = vst [vmem:[#allocation6 + $0x18] sm:$0xff] %v373_v42  ;;  %v388_v43 = vmul.f32 %v1027_v37, %v373_v42 }
 0x11a   :  { %v672_v45 = vsel %vm374_vm4, 1.0, %v849_v61 }
 0x11b   :  { %380 = vst [vmem:[#allocation8 + $0x18] sm:$0xff] %v672_v45  ;;  %v384_v51 = vmul.f32 %v672_v45, %v1017_v31  ;;  %v389_v52 = vadd.f32 %v388_v43, %v204_v41 }
 0x11d   :  { %v385_v55 = vadd.f32 %v384_v51, %v383_v50 }
 0x11f   :  { %v386_v57 = vmul.f32 1.8, %v385_v55  ;;  %v401_v1 = vmul.f32 %v1012_v30, %v385_v55 }
 0x121   :  { %v387_v58 = vadd.f32 1.6, %v386_v57 }
 0x123   :  { %v390_v59 = vmul.f32 %v672_v45, %v387_v58 }
 0x125   :  { %v391_v60 = vsub.f32 %v389_v52, %v390_v59 }
 0x127   :  { %vm392_vm5 = vcmp.gt.f32.partialorder %v391_v60, %v387_v58  ;;  %396 = vst [vmem:[#allocation6 + $0x20] sm:$0xff] %v391_v60  ;;  %v406_v62 = vmul.f32 %v1027_v37, %v391_v60 }
 0x128   :  { %v673_v0 = vsel %vm392_vm5, 1.0, %v849_v61 }
 0x129   :  { %398 = vst [vmem:[#allocation8 + $0x20] sm:$0xff] %v673_v0  ;;  %v402_v2 = vmul.f32 %v673_v0, %v1017_v31  ;;  %v407_v3 = vadd.f32 %v406_v62, %v1053_v63 }
 0x12b   :  { %v403_v39 = vadd.f32 %v402_v2, %v401_v1 }
 0x12d   :  { %v404_v4 = vmul.f32 1.8, %v403_v39  ;;  %v419_v12 = vmul.f32 %v1012_v30, %v403_v39 }
 0x12f   :  { %v405_v6 = vadd.f32 1.6, %v404_v4 }
 0x131   :  { %v408_v7 = vmul.f32 %v673_v0, %v405_v6 }
 0x133   :  { %v409_v9 = vsub.f32 %v407_v3, %v408_v7 }
 0x135   :  { %vm410_vm6 = vcmp.gt.f32.partialorder %v409_v9, %v405_v6  ;;  %414 = vst [vmem:[#allocation6 + $0x28] sm:$0xff] %v409_v9  ;;  %v424_v10 = vmul.f32 %v1027_v37, %v409_v9 }
 0x136   :  { %v674_v11 = vsel %vm410_vm6, 1.0, %v849_v61 }
 0x137   :  { %416 = vst [vmem:[#allocation8 + $0x28] sm:$0xff] %v674_v11  ;;  %v420_v13 = vmul.f32 %v674_v11, %v1017_v31  ;;  %v425_v14 = vadd.f32 %v424_v10, %v1060_v8 }
 0x139   :  { %v421_v15 = vadd.f32 %v420_v13, %v419_v12 }
 0x13b   :  { %v422_v63 = vmul.f32 1.8, %v421_v15  ;;  %v437_v23 = vmul.f32 %v1012_v30, %v421_v15 }
 0x13d   :  { %v423_v17 = vadd.f32 1.6, %v422_v63 }
 0x13f   :  { %v426_v18 = vmul.f32 %v674_v11, %v423_v17 }
 0x141   :  { %v427_v19 = vsub.f32 %v425_v14, %v426_v18 }
 0x143   :  { %vm428_vm7 = vcmp.gt.f32.partialorder %v427_v19, %v423_v17  ;;  %432 = vst [vmem:[#allocation6 + $0x30] sm:$0xff] %v427_v19  ;;  %v442_v20 = vmul.f32 %v1027_v37, %v427_v19 }
 0x144   :  { %v675_v22 = vsel %vm428_vm7, 1.0, %v849_v61 }
 0x145   :  { %434 = vst [vmem:[#allocation8 + $0x30] sm:$0xff] %v675_v22  ;;  %v438_v24 = vmul.f32 %v675_v22, %v1017_v31  ;;  %v443_v25 = vadd.f32 %v442_v20, %v1057_v5 }
 0x147   :  { %v439_v26 = vadd.f32 %v438_v24, %v437_v23 }
 0x149   :  { %v440_v8 = vmul.f32 1.8, %v439_v26  ;;  %v455_v34 = vmul.f32 %v1012_v30, %v439_v26 }
 0x14b   :  { %v441_v27 = vadd.f32 1.6, %v440_v8 }
 0x14d   :  { %v444_v28 = vmul.f32 %v675_v22, %v441_v27 }
 0x14f   :  { %v445_v29 = vsub.f32 %v443_v25, %v444_v28 }
 0x151   :  { %vm446_vm8 = vcmp.gt.f32.partialorder %v445_v29, %v441_v27  ;;  %450 = vst [vmem:[#allocation6 + $0x38] sm:$0xff] %v445_v29  ;;  %v460_v32 = vmul.f32 %v1027_v37, %v445_v29 }
 0x152   :  { %v676_v33 = vsel %vm446_vm8, 1.0, %v849_v61 }
 0x153   :  { %452 = vst [vmem:[#allocation8 + $0x38] sm:$0xff] %v676_v33  ;;  %v456_v35 = vmul.f32 %v676_v33, %v1017_v31  ;;  %v461_v36 = vadd.f32 %v460_v32, %v1040_v48 }
 0x155   :  { %v457_v38 = vadd.f32 %v456_v35, %v455_v34 }
 0x157   :  { %v458_v5 = vmul.f32 1.8, %v457_v38  ;;  %v473_v45 = vmul.f32 %v1012_v30, %v457_v38 }
 0x159   :  { %v459_v40 = vadd.f32 1.6, %v458_v5 }
 0x15b   :  { %v462_v41 = vmul.f32 %v676_v33, %v459_v40 }
 0x15d   :  { %v463_v42 = vsub.f32 %v461_v36, %v462_v41 }
 0x15f   :  { %vm464_vm9 = vcmp.gt.f32.partialorder %v463_v42, %v459_v40  ;;  %468 = vst [vmem:[#allocation6 + $0x40] sm:$0xff] %v463_v42  ;;  %v478_v43 = vmul.f32 %v1027_v37, %v463_v42 }
 0x160   :  { %v677_v44 = vsel %vm464_vm9, 1.0, %v849_v61 }
 0x161   :  { %470 = vst [vmem:[#allocation8 + $0x40] sm:$0xff] %v677_v44  ;;  %v474_v49 = vmul.f32 %v677_v44, %v1017_v31  ;;  %v479_v50 = vadd.f32 %v478_v43, %v1037_v46 }
 0x163   :  { %v475_v51 = vadd.f32 %v474_v49, %v473_v45 }
 0x165   :  { %v476_v48 = vmul.f32 1.8, %v475_v51  ;;  %v491_v60 = vmul.f32 %v1012_v30, %v475_v51 }
 0x167   :  { %v477_v52 = vadd.f32 1.6, %v476_v48 }
 0x169   :  { %v480_v55 = vmul.f32 %v677_v44, %v477_v52 }
 0x16b   :  { %v481_v57 = vsub.f32 %v479_v50, %v480_v55 }
 0x16d   :  { %vm482_vm10 = vcmp.gt.f32.partialorder %v481_v57, %v477_v52  ;;  %486 = vst [vmem:[#allocation6 + $0x48] sm:$0xff] %v481_v57  ;;  %v496_v58 = vmul.f32 %v1027_v37, %v481_v57 }
 0x16e   :  { %v678_v59 = vsel %vm482_vm10, 1.0, %v849_v61 }
 0x16f   :  { %488 = vst [vmem:[#allocation8 + $0x48] sm:$0xff] %v678_v59  ;;  %v492_v62 = vmul.f32 %v678_v59, %v1017_v31  ;;  %v497_v0 = vadd.f32 %v496_v58, %v1046_v56 }
 0x171   :  { %v493_v1 = vadd.f32 %v492_v62, %v491_v60 }
 0x173   :  { %v494_v46 = vmul.f32 1.8, %v493_v1  ;;  %v509_v7 = vmul.f32 %v1012_v30, %v493_v1 }
 0x175   :  { %v495_v2 = vadd.f32 1.6, %v494_v46 }
 0x177   :  { %v498_v3 = vmul.f32 %v678_v59, %v495_v2 }
 0x179   :  { %v499_v39 = vsub.f32 %v497_v0, %v498_v3 }
 0x17b   :  { %vm500_vm11 = vcmp.gt.f32.partialorder %v499_v39, %v495_v2  ;;  %504 = vst [vmem:[#allocation6 + $0x50] sm:$0xff] %v499_v39  ;;  %v514_v4 = vmul.f32 %v1027_v37, %v499_v39 }
 0x17c   :  { %v679_v6 = vsel %vm500_vm11, 1.0, %v849_v61 }
 0x17d   :  { %506 = vst [vmem:[#allocation8 + $0x50] sm:$0xff] %v679_v6  ;;  %v510_v9 = vmul.f32 %v679_v6, %v1017_v31  ;;  %v515_v10 = vadd.f32 %v514_v4, %v1043_v54 }
 0x17f   :  { %v511_v11 = vadd.f32 %v510_v9, %v509_v7 }
 0x181   :  { %v512_v56 = vmul.f32 1.8, %v511_v11  ;;  %v527_v17 = vmul.f32 %v1012_v30, %v511_v11 }
 0x183   :  { %v513_v12 = vadd.f32 1.6, %v512_v56 }
 0x185   :  { %v516_v13 = vmul.f32 %v679_v6, %v513_v12 }
 0x187   :  { %v517_v14 = vsub.f32 %v515_v10, %v516_v13 }
 0x189   :  { %vm518_vm12 = vcmp.gt.f32.partialorder %v517_v14, %v513_v12  ;;  %522 = vst [vmem:[#allocation6 + $0x58] sm:$0xff] %v517_v14  ;;  %v532_v15 = vmul.f32 %v1027_v37, %v517_v14 }
 0x18a   :  { %v680_v63 = vsel %vm518_vm12, 1.0, %v849_v61 }
 0x18b   :  { %524 = vst [vmem:[#allocation8 + $0x58] sm:$0xff] %v680_v63  ;;  %v528_v18 = vmul.f32 %v680_v63, %v1017_v31  ;;  %v533_v19 = vadd.f32 %v532_v15, %v1071_v21 }
 0x18d   :  { %v529_v20 = vadd.f32 %v528_v18, %v527_v17 }
 0x18f   :  { %v530_v54 = vmul.f32 1.8, %v529_v20  ;;  %v545_v8 = vmul.f32 %v1012_v30, %v529_v20 }
 0x191   :  { %v531_v22 = vadd.f32 1.6, %v530_v54 }
 0x193   :  { %v534_v23 = vmul.f32 %v680_v63, %v531_v22 }
 0x195   :  { %v535_v24 = vsub.f32 %v533_v19, %v534_v23 }
 0x197   :  { %vm536_vm13 = vcmp.gt.f32.partialorder %v535_v24, %v531_v22  ;;  %540 = vst [vmem:[#allocation6 + $0x60] sm:$0xff] %v535_v24  ;;  %v550_v25 = vmul.f32 %v1027_v37, %v535_v24 }
 0x198   :  { %v681_v26 = vsel %vm536_vm13, 1.0, %v849_v61 }
 0x199   :  { %542 = vst [vmem:[#allocation8 + $0x60] sm:$0xff] %v681_v26  ;;  %v546_v27 = vmul.f32 %v681_v26, %v1017_v31  ;;  %v551_v28 = vadd.f32 %v550_v25, %v1066_v16 }
 0x19b   :  { %v547_v29 = vadd.f32 %v546_v27, %v545_v8 }
 0x19d   :  { %v548_v21 = vmul.f32 1.8, %v547_v29  ;;  %v563_v38 = vmul.f32 %v1012_v30, %v547_v29 }
 0x19f   :  { %v549_v32 = vadd.f32 1.6, %v548_v21 }
 0x1a1   :  { %v552_v33 = vmul.f32 %v681_v26, %v549_v32 }
 0x1a3   :  { %v553_v34 = vsub.f32 %v551_v28, %v552_v33 }
 0x1a5   :  { %vm554_vm14 = vcmp.gt.f32.partialorder %v553_v34, %v549_v32  ;;  %558 = vst [vmem:[#allocation6 + $0x68] sm:$0xff] %v553_v34  ;;  %v568_v35 = vmul.f32 %v1027_v37, %v553_v34 }
 0x1a6   :  { %v682_v36 = vsel %vm554_vm14, 1.0, %v849_v61 }
 0x1a7   :  { %560 = vst [vmem:[#allocation8 + $0x68] sm:$0xff] %v682_v36  ;;  %v564_v5 = vmul.f32 %v682_v36, %v1017_v31  ;;  %v569_v40 = vadd.f32 %v568_v35, %v1087_v53 }
 0x1a9   :  { %v565_v41 = vadd.f32 %v564_v5, %v563_v38 }
 0x1ab   :  { %v566_v16 = vmul.f32 1.8, %v565_v41  ;;  %v581_v50 = vmul.f32 %v1012_v30, %v565_v41 }
 0x1ad   :  { %v567_v42 = vadd.f32 1.6, %v566_v16 }
 0x1af   :  { %v570_v43 = vmul.f32 %v682_v36, %v567_v42 }
 0x1b1   :  { %v571_v44 = vsub.f32 %v569_v40, %v570_v43 }
 0x1b3   :  { %vm572_vm15 = vcmp.gt.f32.partialorder %v571_v44, %v567_v42  ;;  %576 = vst [vmem:[#allocation6 + $0x70] sm:$0xff] %v571_v44  ;;  %v586_v45 = vmul.f32 %v1027_v37, %v571_v44 }
 0x1b4   :  { %v683_v49 = vsel %vm572_vm15, 1.0, %v849_v61 }
 0x1b5   :  { %578 = vst [vmem:[#allocation8 + $0x70] sm:$0xff] %v683_v49  ;;  %v582_v51 = vmul.f32 %v683_v49, %v1017_v31  ;;  %v587_v48 = vadd.f32 %v586_v45, %v1082_v47 }
 0x1b7   :  { %v583_v52 = vadd.f32 %v582_v51, %v581_v50 }
 0x1b9   :  { %v584_v53 = vmul.f32 1.8, %v583_v52  ;;  %603 = vst [vmem:[#allocation10] sm:$0xff] %v583_v52 }
 0x1bb   :  { %v585_v55 = vadd.f32 1.6, %v584_v53 }
 0x1bd   :  { %v588_v57 = vmul.f32 %v683_v49, %v585_v55 }
 0x1bf   :  { %v589_v37 = vsub.f32 %v587_v48, %v588_v57 }
 0x1c1   :  { %vm590_vm0 = vcmp.gt.f32.partialorder %v589_v37, %v585_v55  ;;  %594 = vst [vmem:[#allocation6 + $0x78] sm:$0xff] %v589_v37 }
 0x1c2   :  { %v684_v30 = vsel %vm590_vm0, 1.0, %v849_v61 }
 0x1c3   :  { %790 = shalt.err (!%p787_p4)
}
 0x1c4   :  { %s791_s1 = scalar_lea.hbm %s1204_s9, 2048 }
 0x1c5   :  { %p792_p5 = scmp.ne.s32.totalorder %s1204_s9, %s791_s1  ;;  %p795_p6 = scmp.lt.u32.totalorder %s791_s1, %s1204_s9 }
 0x1c7   :  { %p797_p7 = pnand %p795_p6, %p792_p5 }
 0x1c9   :  { %800 = shalt.err (!%p797_p7)
}
 0x1ca   :  { %s853_s25 = smov 128   ;;  %s854_s26 = smov 8   ;;  %596 = vst [vmem:[#allocation8 + $0x78] sm:$0xff] %v684_v30 }
 0x1cb   :  { %615 = dma.vmem_to_hbm [thread:$0]  %s610_s3, 2048, %s1204_s9, [#allocation7], %s853_s25, %s853_s25, %s854_s26  }
 0x1cc   :  { %s801_s29 = scalar_lea.vmem %s1144_s6, 2048  ;;  %p806_p9 = scmp.lt.s32.totalorder %s1144_s6, %s1144_s6 }
 0x1cd   :  { %p802_p8 = scmp.ne.s32.totalorder %s1144_s6, %s801_s29  ;;  %p807_p10 = scmp.lt.s32.totalorder %s801_s29, %s801_s29 }
 0x1cf   :  { %p808_p11 = por %p807_p10, %p806_p9 }
 0x1d1   :  { %p809_p12 = pnand %p808_p11, %p802_p8 }
 0x1d3   :  { %812 = shalt.err (!%p809_p12)
}
 0x1d4   :  { %s813_s13 = scalar_lea.hbm %s1205_s10, 2048 }
 0x1d5   :  { %p814_p13 = scmp.ne.s32.totalorder %s1205_s10, %s813_s13  ;;  %p817_p0 = scmp.lt.u32.totalorder %s813_s13, %s1205_s10 }
 0x1d7   :  { %p819_p1 = pnand %p817_p0, %p814_p13 }
 0x1d9   :  { %822 = shalt.err (!%p819_p1)
}
 0x1da   :  { %627 = dma.vmem_to_hbm [thread:$0]  %s1144_s6, 2048, %s1205_s10, [#allocation9], %s853_s25, %s853_s25, %s854_s26  }
 0x1db   :  { %s823_s15 = scalar_lea.vmem %s1146_s17, 128  ;;  %p828_p3 = scmp.lt.s32.totalorder %s1146_s17, %s1146_s17 }
 0x1dc   :  { %p824_p2 = scmp.ne.s32.totalorder %s1146_s17, %s823_s15  ;;  %p829_p4 = scmp.lt.s32.totalorder %s823_s15, %s823_s15 }
 0x1de   :  { %p830_p5 = por %p829_p4, %p828_p3 }
 0x1e0   :  { %p831_p6 = pnand %p830_p5, %p824_p2 }
 0x1e2   :  { %834 = shalt.err (!%p831_p6)
}
 0x1e3   :  { %s835_s5 = scalar_lea.hbm %s1206_s11, 128 }
 0x1e4   :  { %p836_p7 = scmp.ne.s32.totalorder %s1206_s11, %s835_s5  ;;  %p839_p8 = scmp.lt.u32.totalorder %s835_s5, %s1206_s11 }
 0x1e6   :  { %p841_p9 = pnand %p839_p8, %p836_p7 }
 0x1e8   :  { %844 = shalt.err (!%p841_p9)
}
 0x1e9   :  { %637 = dma.vmem_to_hbm [thread:$0]  %s1146_s17, 128, %s1206_s11, [#allocation9]  }
 0x1ea   :  { %845 = dma.done.wait [#allocation7], 2048  }
 0x1eb   :  { %846 = vsyncadd [#allocation7], 4294965248 }
 0x1ec   :  { %847 = dma.done.wait [#allocation9], 2176  }
 0x1ed   :  { %848 = vsyncadd [#allocation9], 4294965120 }
 0x1ee   :  { %647 = vsyncpa [#allocation7], 1 }
 0x1ef   :  { %648 = vsyncpa [#allocation9], 1 }

</bundles_post_ra>
